<compile_context>
chip_gen: v6e
topology: v6e:2x2x1
jax: 0.10.0
libtpu: 0.0.40
codegen_flags: <defaults>
</compile_context>

<pallas_src>
import functools

import numpy as np
import jax
import jax.numpy as jnp
from jax.experimental import pallas as pl
from jax.experimental.pallas import tpu as pltpu

K = 4  # ConvTranspose2d kernel size


def _cdiv(a, b):
    return -(-a // b)


def _vmem_limit_bytes():
    """Per-chip VMEM-aware scoped limit (v5e/v6e: 128 MiB, v7x: 64 MiB)."""
    cap = 64 * 1024 * 1024
    try:
        cap = int(pltpu.get_tpu_info().vmem_capacity_bytes)
    except Exception:
        pass
    return max(32 * 1024 * 1024, min((cap * 3) // 5, 96 * 1024 * 1024))


def _pick_tile_rows(H, W, Cin, Cout, Cskip, budget, max_tile_rows=None):
    """Largest input-row tile TH whose per-step VMEM footprint fits the budget."""
    hi = H if max_tile_rows is None else max(1, min(H, max_tile_rows))
    target_out_rows = 2048  # amortize per-grid-step overhead / reach HBM roofline

    def est(th):
        thw = th * W
        orows = 4 * thw                              # output rows per tile (2*TH * 2*W)
        in_b = (th + 2) * (W + 2) * Cin * 2          # bf16 halo'd input tile
        w_b = 16 * Cin * Cout * 2                    # resident per-(phase,tap) weights
        conv_b = orows * Cout * 2                    # bf16 conv tile
        skip_b = orows * Cskip * 4
        out_b = orows * (Cout + Cskip) * 4
        work_a = 9 * thw * Cin * 2 + 3 * orows * Cout * 4
        work_b = orows * Cout * 4
        pass_a = 2 * in_b + 2 * w_b + 2 * conv_b + work_a
        pass_b = 2 * conv_b + 2 * skip_b + 2 * out_b + work_b
        return max(pass_a, pass_b)

    th = 1
    for cand in range(1, hi + 1):
        if est(cand) > budget:
            break
        th = cand
        if 4 * cand * W >= target_out_rows:
            break
    return th


def _conv_stats_kernel(x_ref, w_ref, conv_ref, stats_ref, *, TH, W, Cout, H, masked):
    """Pass A: 4-phase transposed-conv matmuls + per-tile BN partial statistics.

    x_ref    : (1, 1, TH+2, W+2, Cin) bf16  halo'd input tile
    w_ref    : (16, Cin, Cout)        bf16  per-(phase, tap) weights (resident)
    conv_ref : (1, TH, 2, W, 2*Cout)  bf16  free reshape of NHWC conv rows
    stats_ref: (1, 1, 2, Cout)        f32   row 0 = sum, row 1 = sum of squares
    """
    THW = TH * W

    # 9 shared shifted windows (dh, dw) of the halo'd tile, flattened to rows.
    xs = {}
    for dh in range(3):
        for dw in range(3):
            xs[(dh, dw)] = x_ref[0, 0, dh:dh + TH, dw:dw + W, :].reshape(THW, -1)

    # Per output-parity phase (po, pw): accumulate its 4 taps on the MXU.
    accs = {}
    for po in (0, 1):
        for pw in (0, 1):
            acc = None
            for a in (0, 1):
                for b in (0, 1):
                    widx = ((po * 2 + pw) * 2 + a) * 2 + b
                    d = jnp.dot(xs[(po + a, pw + b)], w_ref[widx],
                                preferred_element_type=jnp.float32)
                    acc = d if acc is None else acc + d
            accs[(po, pw)] = acc                              # (THW, Cout) f32

    # Rows past the true height (zero padding of awkward H) must not pollute the
    # batch statistics; they are sliced off the final output in the wrapper.
    if masked:
        t = pl.program_id(1)
        valid = (H - t * TH) * W
        keep = jax.lax.broadcasted_iota(jnp.int32, (THW, 1), 0) < valid
        for k in accs:
            accs[k] = jnp.where(keep, accs[k], 0.0)

    # Partial BN stats via ones-matmuls (MXU, not a cross-sublane XLU reduce).
    ones = jnp.ones((1, THW), jnp.float32)
    s = None
    ss = None
    for acc in accs.values():
        s1 = jnp.dot(ones, acc, preferred_element_type=jnp.float32)
        s2 = jnp.dot(ones, acc * acc, preferred_element_type=jnp.float32)
        s = s1 if s is None else s + s1
        ss = s2 if ss is None else ss + s2
    stats_ref[...] = jnp.concatenate([s, ss], axis=0)[None, None]

    # Assemble the block in final NHWC order: last dim is (ow%2)*Cout + c (lane
    # concat), dim -3 is oh%2 (leading-dim stack) -- no XLA relayout afterwards.
    z0 = jnp.concatenate([accs[(0, 0)], accs[(0, 1)]], axis=-1).reshape(TH, W, 2 * Cout)
    z1 = jnp.concatenate([accs[(1, 0)], accs[(1, 1)]], axis=-1).reshape(TH, W, 2 * Cout)
    conv_ref[0] = jnp.stack([z0, z1], axis=1).astype(jnp.bfloat16)


def _bn_relu_concat_kernel(conv_ref, skip_ref, scale_ref, bias_ref, out_ref, *,
                           Cout, split_store):
    """Pass B: folded BatchNorm (y = conv*scale + bias), ReLU, concat skip.

    conv_ref : (1, 2*TH, 2*W, Cout)  bf16
    skip_ref : (1, 2*TH, 2*W, Cskip) f32
    scale/bias: (1, Cout)            f32
    out_ref  : (1, 2*TH, 2*W, Cout+Cskip) f32
    """
    y = conv_ref[0].astype(jnp.float32) * scale_ref[...] + bias_ref[...]
    y = jnp.maximum(y, 0.0)
    skip = skip_ref[0]
    if split_store:
        # Both halves lane-aligned: two unmasked full-width stores.
        out_ref[0, :, :, :Cout] = y
        out_ref[0, :, :, Cout:] = skip
    else:
        out_ref[0] = jnp.concatenate([y, skip], axis=-1)


def unet_up_forward(x_nchw, w_ct, gamma, beta, skip_nchw, eps=1e-5,
                    max_tile_rows=None):
    """x_nchw: (N, Cin, H, W); w_ct: (Cin, Cout, 4, 4) [PyTorch CT layout];
       skip_nchw: (N, Cskip, 2H, 2W).  Returns (N, Cout+Cskip, 2H, 2W)."""
    N, Cin, H, W = x_nchw.shape
    Cout = w_ct.shape[1]
    Cskip = skip_nchw.shape[1]
    OH, OW = 2 * H, 2 * W
    Ctot = Cout + Cskip

    vmem_limit = _vmem_limit_bytes()
    TH = _pick_tile_rows(H, W, Cin, Cout, Cskip, budget=(vmem_limit * 7) // 10,
                         max_tile_rows=max_tile_rows)
    T = _cdiv(H, TH)
    TH = _cdiv(H, T)              # rebalance to minimize zero padding
    H_pad = T * TH
    masked = H_pad != H

    # ---- input prep (bf16 before any copy; ~1x input bytes of XLA traffic) ----
    x_nhwc = jnp.transpose(x_nchw.astype(jnp.bfloat16), (0, 2, 3, 1))
    x_pad = jnp.pad(x_nhwc, ((0, 0), (1, 1 + H_pad - H), (1, 1), (0, 0)))
    row_idx = np.arange(T)[:, None] * TH + np.arange(TH + 2)[None, :]
    x_tiles = x_pad[:, row_idx]                       # (N, T, TH+2, W+2, Cin) bf16

    # Effective per-(phase, tap) weights: out[., 2h+po, 2w+pw] uses tap
    # (3-po-2a, 3-pw-2b) applied to x_pad[., po+a+h, pw+b+w].
    w_list = [w_ct[:, :, 3 - po - 2 * a, 3 - pw - 2 * b]
              for po in (0, 1) for pw in (0, 1) for a in (0, 1) for b in (0, 1)]
    w_eff = jnp.stack(w_list, axis=0).astype(jnp.bfloat16)   # (16, Cin, Cout)

    grid = (N, T)
    cparams = pltpu.CompilerParams(
        dimension_semantics=("parallel", "parallel"),
        vmem_limit_bytes=vmem_limit)

    # ---- Pass A: transposed conv (all 4 phases) + per-tile BN statistics ----
    conv5, partial_stats = pl.pallas_call(
        functools.partial(_conv_stats_kernel, TH=TH, W=W, Cout=Cout, H=H,
                          masked=masked),
        out_shape=(jax.ShapeDtypeStruct((N, H_pad, 2, W, 2 * Cout), jnp.bfloat16),
                   jax.ShapeDtypeStruct((N, T, 2, Cout), jnp.float32)),
        grid_spec=pltpu.PrefetchScalarGridSpec(
            num_scalar_prefetch=0,
            grid=grid,
            in_specs=[
                pl.BlockSpec((1, 1, TH + 2, W + 2, Cin),
                             lambda n, t: (n, t, 0, 0, 0)),
                pl.BlockSpec((16, Cin, Cout), lambda n, t: (0, 0, 0)),
            ],
            out_specs=[
                pl.BlockSpec((1, TH, 2, W, 2 * Cout),
                             lambda n, t: (n, t, 0, 0, 0)),
                pl.BlockSpec((1, 1, 2, Cout), lambda n, t: (n, t, 0, 0)),
            ],
        ),
        compiler_params=cparams,
    )(x_tiles, w_eff)

    # Free (bitcast) reshape to contiguous NHWC conv rows.
    conv = conv5.reshape(N, 2 * H_pad, 2 * W, Cout)

    # ---- tiny cross-tile stat reduction + gamma/beta folding (XLA) ----
    sums = partial_stats.sum(axis=(0, 1))             # (2, Cout)
    cnt = float(N * OH * OW)
    mean = sums[0] / cnt
    var = jnp.maximum(sums[1] / cnt - mean * mean, 0.0)   # biased, like PyTorch BN
    scale = gamma.astype(jnp.float32) * jax.lax.rsqrt(var + eps)
    bias = beta.astype(jnp.float32) - mean * scale
    scale2 = scale.reshape(1, Cout)
    bias2 = bias.reshape(1, Cout)

    # ---- skip: NCHW -> NHWC (pad rows only if the height was padded) ----
    skip_nhwc = jnp.transpose(skip_nchw, (0, 2, 3, 1)).astype(jnp.float32)
    if masked:
        skip_nhwc = jnp.pad(skip_nhwc,
                            ((0, 0), (0, 2 * (H_pad - H)), (0, 0), (0, 0)))

    split_store = (Cout % 128 == 0) and (Cskip % 128 == 0)

    # ---- Pass B: normalize + ReLU + concat, written directly in NHWC ----
    out_p = pl.pallas_call(
        functools.partial(_bn_relu_concat_kernel, Cout=Cout,
                          split_store=split_store),
        out_shape=jax.ShapeDtypeStruct((N, 2 * H_pad, 2 * W, Ctot), jnp.float32),
        grid_spec=pltpu.PrefetchScalarGridSpec(
            num_scalar_prefetch=0,
            grid=grid,
            in_specs=[
                pl.BlockSpec((1, 2 * TH, 2 * W, Cout), lambda n, t: (n, t, 0, 0)),
                pl.BlockSpec((1, 2 * TH, 2 * W, Cskip), lambda n, t: (n, t, 0, 0)),
                pl.BlockSpec((1, Cout), lambda n, t: (0, 0)),
                pl.BlockSpec((1, Cout), lambda n, t: (0, 0)),
            ],
            out_specs=pl.BlockSpec((1, 2 * TH, 2 * W, Ctot),
                                   lambda n, t: (n, t, 0, 0)),
        ),
        compiler_params=cparams,
    )(conv, skip_nhwc, scale2, bias2)

    out_nhwc = out_p[:, :OH] if masked else out_p
    # The module contract is NCHW, so one output transpose remains.
    return jnp.transpose(out_nhwc, (0, 3, 1, 2))


def ref_forward(x, w, gamma, beta, skip, eps=1e-5):
    """Independent NumPy reference of UNetUp.forward (NCHW)."""
    x = np.asarray(x, np.float64)
    w = np.asarray(w, np.float64)
    gamma = np.asarray(gamma, np.float64)
    beta = np.asarray(beta, np.float64)
    skip = np.asarray(skip, np.float64)
    N, Cin, H, W = x.shape
    Cout = w.shape[1]
    OH, OW = 2 * H, 2 * W
    y = np.zeros((N, Cout, OH, OW))
    for kh in range(K):
        for kw in range(K):
            for ih in range(H):
                for iw in range(W):
                    oh = 2 * ih + kh - 1
                    ow = 2 * iw + kw - 1
                    if 0 <= oh < OH and 0 <= ow < OW:
                        y[:, :, oh, ow] += x[:, :, ih, iw] @ w[:, :, kh, kw]
    mean = y.mean(axis=(0, 2, 3), keepdims=True)
    var = y.var(axis=(0, 2, 3), keepdims=True)         # biased, like PyTorch BN
    y = (y - mean) / np.sqrt(var + eps)
    y = y * gamma.reshape(1, -1, 1, 1) + beta.reshape(1, -1, 1, 1)
    y = np.maximum(y, 0.0)
    return np.concatenate([y, skip], axis=1).astype(np.float32)


if __name__ == "__main__":
    key = jax.random.PRNGKey(0)

    def run_case(case_key, N, Cin, Cout, Cskip, H, W, max_tile_rows=None):
        kx, kw, ks, kg, kb = jax.random.split(case_key, 5)
        x = jax.random.normal(kx, (N, Cin, H, W), jnp.float32)
        w = jax.random.normal(kw, (Cin, Cout, K, K), jnp.float32) * 0.1
        skip = jax.random.normal(ks, (N, Cskip, 2 * H, 2 * W), jnp.float32)
        gamma = 1.0 + 0.1 * jax.random.normal(kg, (Cout,), jnp.float32)
        beta = 0.1 * jax.random.normal(kb, (Cout,), jnp.float32)

        fwd = jax.jit(functools.partial(unet_up_forward,
                                        max_tile_rows=max_tile_rows))
        out = jax.block_until_ready(fwd(x, w, gamma, beta, skip))
        assert out.shape == (N, Cout + Cskip, 2 * H, 2 * W), out.shape

        ref = ref_forward(x, w, gamma, beta, skip)
        np.testing.assert_allclose(np.asarray(out), ref, rtol=5e-2, atol=5e-2)

    k1, k2 = jax.random.split(key)
    # Main case (single tile, no height padding).
    run_case(k1, N=2, Cin=8, Cout=4, Cskip=4, H=8, W=8)
    # Multi-tile case exercising height padding + the in-kernel stats mask.
    run_case(k2, N=1, Cin=16, Cout=8, Cskip=6, H=5, W=4, max_tile_rows=2)

    print("KERNEL_OK")
</pallas_src>

<mosaic_0001>
module attributes {stable_mosaic.version = 11 : i64} {
  func.func @_conv_stats_kernel(%arg0: i32, %arg1: i32, %arg2: memref<1x1x10x10x8xbf16, #tpu.memory_space<vmem>>, %arg3: memref<16x8x4xbf16, #tpu.memory_space<vmem>>, %arg4: memref<1x8x2x8x8xbf16, #tpu.memory_space<vmem>>, %arg5: memref<1x1x2x4xf32, #tpu.memory_space<vmem>>) attributes {dimension_semantics = [#tpu.dimension_semantics<parallel>, #tpu.dimension_semantics<parallel>], iteration_bounds = array<i64: 2, 1>, scalar_prefetch = 0 : i64, scratch_operands = 0 : i64, tpu.core_type = #tpu.core_type<tc>, window_params = [{transform_indices = @transform_0, window_bounds = array<i64: 1, 1, 10, 10, 8>}, {pipeline_mode = #tpu.pipeline_mode<synchronous>, transform_indices = @transform_1, window_bounds = array<i64: 16, 8, 4>}, {transform_indices = @transform_2, window_bounds = array<i64: 1, 8, 2, 8, 8>}, {transform_indices = @transform_3, window_bounds = array<i64: 1, 1, 2, 4>}]} {
    %c0 = arith.constant 0 : index
    %c0_0 = arith.constant 0 : index
    %c0_1 = arith.constant 0 : index
    %c0_2 = arith.constant 0 : index
    %c0_3 = arith.constant 0 : index
    %0 = vector.load %arg2[%c0, %c0_0, %c0_1, %c0_2, %c0_3] : memref<1x1x10x10x8xbf16, #tpu.memory_space<vmem>>, vector<1x1x8x8x8xbf16>
    %1 = vector.shape_cast %0 : vector<1x1x8x8x8xbf16> to vector<8x8x8xbf16>
    %2 = vector.shape_cast %1 : vector<8x8x8xbf16> to vector<64x8xbf16>
    %c0_4 = arith.constant 0 : index
    %c0_5 = arith.constant 0 : index
    %c0_6 = arith.constant 0 : index
    %c1 = arith.constant 1 : index
    %c0_7 = arith.constant 0 : index
    %3 = vector.load %arg2[%c0_4, %c0_5, %c0_6, %c1, %c0_7] : memref<1x1x10x10x8xbf16, #tpu.memory_space<vmem>>, vector<1x1x8x8x8xbf16>
    %4 = vector.shape_cast %3 : vector<1x1x8x8x8xbf16> to vector<8x8x8xbf16>
    %5 = vector.shape_cast %4 : vector<8x8x8xbf16> to vector<64x8xbf16>
    %c0_8 = arith.constant 0 : index
    %c0_9 = arith.constant 0 : index
    %c0_10 = arith.constant 0 : index
    %c2 = arith.constant 2 : index
    %c0_11 = arith.constant 0 : index
    %6 = vector.load %arg2[%c0_8, %c0_9, %c0_10, %c2, %c0_11] : memref<1x1x10x10x8xbf16, #tpu.memory_space<vmem>>, vector<1x1x8x8x8xbf16>
    %7 = vector.shape_cast %6 : vector<1x1x8x8x8xbf16> to vector<8x8x8xbf16>
    %8 = vector.shape_cast %7 : vector<8x8x8xbf16> to vector<64x8xbf16>
    %c0_12 = arith.constant 0 : index
    %c0_13 = arith.constant 0 : index
    %c1_14 = arith.constant 1 : index
    %c0_15 = arith.constant 0 : index
    %c0_16 = arith.constant 0 : index
    %9 = vector.load %arg2[%c0_12, %c0_13, %c1_14, %c0_15, %c0_16] : memref<1x1x10x10x8xbf16, #tpu.memory_space<vmem>>, vector<1x1x8x8x8xbf16>
    %10 = vector.shape_cast %9 : vector<1x1x8x8x8xbf16> to vector<8x8x8xbf16>
    %11 = vector.shape_cast %10 : vector<8x8x8xbf16> to vector<64x8xbf16>
    %c0_17 = arith.constant 0 : index
    %c0_18 = arith.constant 0 : index
    %c1_19 = arith.constant 1 : index
    %c1_20 = arith.constant 1 : index
    %c0_21 = arith.constant 0 : index
    %12 = vector.load %arg2[%c0_17, %c0_18, %c1_19, %c1_20, %c0_21] : memref<1x1x10x10x8xbf16, #tpu.memory_space<vmem>>, vector<1x1x8x8x8xbf16>
    %13 = vector.shape_cast %12 : vector<1x1x8x8x8xbf16> to vector<8x8x8xbf16>
    %14 = vector.shape_cast %13 : vector<8x8x8xbf16> to vector<64x8xbf16>
    %c0_22 = arith.constant 0 : index
    %c0_23 = arith.constant 0 : index
    %c1_24 = arith.constant 1 : index
    %c2_25 = arith.constant 2 : index
    %c0_26 = arith.constant 0 : index
    %15 = vector.load %arg2[%c0_22, %c0_23, %c1_24, %c2_25, %c0_26] : memref<1x1x10x10x8xbf16, #tpu.memory_space<vmem>>, vector<1x1x8x8x8xbf16>
    %16 = vector.shape_cast %15 : vector<1x1x8x8x8xbf16> to vector<8x8x8xbf16>
    %17 = vector.shape_cast %16 : vector<8x8x8xbf16> to vector<64x8xbf16>
    %c0_27 = arith.constant 0 : index
    %c0_28 = arith.constant 0 : index
    %c2_29 = arith.constant 2 : index
    %c0_30 = arith.constant 0 : index
    %c0_31 = arith.constant 0 : index
    %18 = vector.load %arg2[%c0_27, %c0_28, %c2_29, %c0_30, %c0_31] : memref<1x1x10x10x8xbf16, #tpu.memory_space<vmem>>, vector<1x1x8x8x8xbf16>
    %19 = vector.shape_cast %18 : vector<1x1x8x8x8xbf16> to vector<8x8x8xbf16>
    %20 = vector.shape_cast %19 : vector<8x8x8xbf16> to vector<64x8xbf16>
    %c0_32 = arith.constant 0 : index
    %c0_33 = arith.constant 0 : index
    %c2_34 = arith.constant 2 : index
    %c1_35 = arith.constant 1 : index
    %c0_36 = arith.constant 0 : index
    %21 = vector.load %arg2[%c0_32, %c0_33, %c2_34, %c1_35, %c0_36] : memref<1x1x10x10x8xbf16, #tpu.memory_space<vmem>>, vector<1x1x8x8x8xbf16>
    %22 = vector.shape_cast %21 : vector<1x1x8x8x8xbf16> to vector<8x8x8xbf16>
    %23 = vector.shape_cast %22 : vector<8x8x8xbf16> to vector<64x8xbf16>
    %c0_37 = arith.constant 0 : index
    %c0_38 = arith.constant 0 : index
    %c2_39 = arith.constant 2 : index
    %c2_40 = arith.constant 2 : index
    %c0_41 = arith.constant 0 : index
    %24 = vector.load %arg2[%c0_37, %c0_38, %c2_39, %c2_40, %c0_41] : memref<1x1x10x10x8xbf16, #tpu.memory_space<vmem>>, vector<1x1x8x8x8xbf16>
    %25 = vector.shape_cast %24 : vector<1x1x8x8x8xbf16> to vector<8x8x8xbf16>
    %26 = vector.shape_cast %25 : vector<8x8x8xbf16> to vector<64x8xbf16>
    %c0_42 = arith.constant 0 : index
    %c0_43 = arith.constant 0 : index
    %c0_44 = arith.constant 0 : index
    %27 = vector.load %arg3[%c0_42, %c0_43, %c0_44] : memref<16x8x4xbf16, #tpu.memory_space<vmem>>, vector<1x8x4xbf16>
    %28 = vector.shape_cast %27 : vector<1x8x4xbf16> to vector<8x4xbf16>
    %cst = arith.constant dense<0.000000e+00> : vector<64x4xf32>
    %29 = tpu.matmul %2, %28, %cst {dimension_numbers = #tpu.dot_dimension_numbers<[1], [0], [0], [1], [0, 0, 1, 1], [], []>} : vector<64x8xbf16>, vector<8x4xbf16>, vector<64x4xf32> -> vector<64x4xf32>
    %c1_45 = arith.constant 1 : index
    %c0_46 = arith.constant 0 : index
    %c0_47 = arith.constant 0 : index
    %30 = vector.load %arg3[%c1_45, %c0_46, %c0_47] : memref<16x8x4xbf16, #tpu.memory_space<vmem>>, vector<1x8x4xbf16>
    %31 = vector.shape_cast %30 : vector<1x8x4xbf16> to vector<8x4xbf16>
    %cst_48 = arith.constant dense<0.000000e+00> : vector<64x4xf32>
    %32 = tpu.matmul %5, %31, %cst_48 {dimension_numbers = #tpu.dot_dimension_numbers<[1], [0], [0], [1], [0, 0, 1, 1], [], []>} : vector<64x8xbf16>, vector<8x4xbf16>, vector<64x4xf32> -> vector<64x4xf32>
    %33 = arith.addf %29, %32 : vector<64x4xf32>
    %c2_49 = arith.constant 2 : index
    %c0_50 = arith.constant 0 : index
    %c0_51 = arith.constant 0 : index
    %34 = vector.load %arg3[%c2_49, %c0_50, %c0_51] : memref<16x8x4xbf16, #tpu.memory_space<vmem>>, vector<1x8x4xbf16>
    %35 = vector.shape_cast %34 : vector<1x8x4xbf16> to vector<8x4xbf16>
    %cst_52 = arith.constant dense<0.000000e+00> : vector<64x4xf32>
    %36 = tpu.matmul %11, %35, %cst_52 {dimension_numbers = #tpu.dot_dimension_numbers<[1], [0], [0], [1], [0, 0, 1, 1], [], []>} : vector<64x8xbf16>, vector<8x4xbf16>, vector<64x4xf32> -> vector<64x4xf32>
    %37 = arith.addf %33, %36 : vector<64x4xf32>
    %c3 = arith.constant 3 : index
    %c0_53 = arith.constant 0 : index
    %c0_54 = arith.constant 0 : index
    %38 = vector.load %arg3[%c3, %c0_53, %c0_54] : memref<16x8x4xbf16, #tpu.memory_space<vmem>>, vector<1x8x4xbf16>
    %39 = vector.shape_cast %38 : vector<1x8x4xbf16> to vector<8x4xbf16>
    %cst_55 = arith.constant dense<0.000000e+00> : vector<64x4xf32>
    %40 = tpu.matmul %14, %39, %cst_55 {dimension_numbers = #tpu.dot_dimension_numbers<[1], [0], [0], [1], [0, 0, 1, 1], [], []>} : vector<64x8xbf16>, vector<8x4xbf16>, vector<64x4xf32> -> vector<64x4xf32>
    %41 = arith.addf %37, %40 : vector<64x4xf32>
    %c4 = arith.constant 4 : index
    %c0_56 = arith.constant 0 : index
    %c0_57 = arith.constant 0 : index
    %42 = vector.load %arg3[%c4, %c0_56, %c0_57] : memref<16x8x4xbf16, #tpu.memory_space<vmem>>, vector<1x8x4xbf16>
    %43 = vector.shape_cast %42 : vector<1x8x4xbf16> to vector<8x4xbf16>
    %cst_58 = arith.constant dense<0.000000e+00> : vector<64x4xf32>
    %44 = tpu.matmul %5, %43, %cst_58 {dimension_numbers = #tpu.dot_dimension_numbers<[1], [0], [0], [1], [0, 0, 1, 1], [], []>} : vector<64x8xbf16>, vector<8x4xbf16>, vector<64x4xf32> -> vector<64x4xf32>
    %c5 = arith.constant 5 : index
    %c0_59 = arith.constant 0 : index
    %c0_60 = arith.constant 0 : index
    %45 = vector.load %arg3[%c5, %c0_59, %c0_60] : memref<16x8x4xbf16, #tpu.memory_space<vmem>>, vector<1x8x4xbf16>
    %46 = vector.shape_cast %45 : vector<1x8x4xbf16> to vector<8x4xbf16>
    %cst_61 = arith.constant dense<0.000000e+00> : vector<64x4xf32>
    %47 = tpu.matmul %8, %46, %cst_61 {dimension_numbers = #tpu.dot_dimension_numbers<[1], [0], [0], [1], [0, 0, 1, 1], [], []>} : vector<64x8xbf16>, vector<8x4xbf16>, vector<64x4xf32> -> vector<64x4xf32>
    %48 = arith.addf %44, %47 : vector<64x4xf32>
    %c6 = arith.constant 6 : index
    %c0_62 = arith.constant 0 : index
    %c0_63 = arith.constant 0 : index
    %49 = vector.load %arg3[%c6, %c0_62, %c0_63] : memref<16x8x4xbf16, #tpu.memory_space<vmem>>, vector<1x8x4xbf16>
    %50 = vector.shape_cast %49 : vector<1x8x4xbf16> to vector<8x4xbf16>
    %cst_64 = arith.constant dense<0.000000e+00> : vector<64x4xf32>
    %51 = tpu.matmul %14, %50, %cst_64 {dimension_numbers = #tpu.dot_dimension_numbers<[1], [0], [0], [1], [0, 0, 1, 1], [], []>} : vector<64x8xbf16>, vector<8x4xbf16>, vector<64x4xf32> -> vector<64x4xf32>
    %52 = arith.addf %48, %51 : vector<64x4xf32>
    %c7 = arith.constant 7 : index
    %c0_65 = arith.constant 0 : index
    %c0_66 = arith.constant 0 : index
    %53 = vector.load %arg3[%c7, %c0_65, %c0_66] : memref<16x8x4xbf16, #tpu.memory_space<vmem>>, vector<1x8x4xbf16>
    %54 = vector.shape_cast %53 : vector<1x8x4xbf16> to vector<8x4xbf16>
    %cst_67 = arith.constant dense<0.000000e+00> : vector<64x4xf32>
    %55 = tpu.matmul %17, %54, %cst_67 {dimension_numbers = #tpu.dot_dimension_numbers<[1], [0], [0], [1], [0, 0, 1, 1], [], []>} : vector<64x8xbf16>, vector<8x4xbf16>, vector<64x4xf32> -> vector<64x4xf32>
    %56 = arith.addf %52, %55 : vector<64x4xf32>
    %c8 = arith.constant 8 : index
    %c0_68 = arith.constant 0 : index
    %c0_69 = arith.constant 0 : index
    %57 = vector.load %arg3[%c8, %c0_68, %c0_69] : memref<16x8x4xbf16, #tpu.memory_space<vmem>>, vector<1x8x4xbf16>
    %58 = vector.shape_cast %57 : vector<1x8x4xbf16> to vector<8x4xbf16>
    %cst_70 = arith.constant dense<0.000000e+00> : vector<64x4xf32>
    %59 = tpu.matmul %11, %58, %cst_70 {dimension_numbers = #tpu.dot_dimension_numbers<[1], [0], [0], [1], [0, 0, 1, 1], [], []>} : vector<64x8xbf16>, vector<8x4xbf16>, vector<64x4xf32> -> vector<64x4xf32>
    %c9 = arith.constant 9 : index
    %c0_71 = arith.constant 0 : index
    %c0_72 = arith.constant 0 : index
    %60 = vector.load %arg3[%c9, %c0_71, %c0_72] : memref<16x8x4xbf16, #tpu.memory_space<vmem>>, vector<1x8x4xbf16>
    %61 = vector.shape_cast %60 : vector<1x8x4xbf16> to vector<8x4xbf16>
    %cst_73 = arith.constant dense<0.000000e+00> : vector<64x4xf32>
    %62 = tpu.matmul %14, %61, %cst_73 {dimension_numbers = #tpu.dot_dimension_numbers<[1], [0], [0], [1], [0, 0, 1, 1], [], []>} : vector<64x8xbf16>, vector<8x4xbf16>, vector<64x4xf32> -> vector<64x4xf32>
    %63 = arith.addf %59, %62 : vector<64x4xf32>
    %c10 = arith.constant 10 : index
    %c0_74 = arith.constant 0 : index
    %c0_75 = arith.constant 0 : index
    %64 = vector.load %arg3[%c10, %c0_74, %c0_75] : memref<16x8x4xbf16, #tpu.memory_space<vmem>>, vector<1x8x4xbf16>
    %65 = vector.shape_cast %64 : vector<1x8x4xbf16> to vector<8x4xbf16>
    %cst_76 = arith.constant dense<0.000000e+00> : vector<64x4xf32>
    %66 = tpu.matmul %20, %65, %cst_76 {dimension_numbers = #tpu.dot_dimension_numbers<[1], [0], [0], [1], [0, 0, 1, 1], [], []>} : vector<64x8xbf16>, vector<8x4xbf16>, vector<64x4xf32> -> vector<64x4xf32>
    %67 = arith.addf %63, %66 : vector<64x4xf32>
    %c11 = arith.constant 11 : index
    %c0_77 = arith.constant 0 : index
    %c0_78 = arith.constant 0 : index
    %68 = vector.load %arg3[%c11, %c0_77, %c0_78] : memref<16x8x4xbf16, #tpu.memory_space<vmem>>, vector<1x8x4xbf16>
    %69 = vector.shape_cast %68 : vector<1x8x4xbf16> to vector<8x4xbf16>
    %cst_79 = arith.constant dense<0.000000e+00> : vector<64x4xf32>
    %70 = tpu.matmul %23, %69, %cst_79 {dimension_numbers = #tpu.dot_dimension_numbers<[1], [0], [0], [1], [0, 0, 1, 1], [], []>} : vector<64x8xbf16>, vector<8x4xbf16>, vector<64x4xf32> -> vector<64x4xf32>
    %71 = arith.addf %67, %70 : vector<64x4xf32>
    %c12 = arith.constant 12 : index
    %c0_80 = arith.constant 0 : index
    %c0_81 = arith.constant 0 : index
    %72 = vector.load %arg3[%c12, %c0_80, %c0_81] : memref<16x8x4xbf16, #tpu.memory_space<vmem>>, vector<1x8x4xbf16>
    %73 = vector.shape_cast %72 : vector<1x8x4xbf16> to vector<8x4xbf16>
    %cst_82 = arith.constant dense<0.000000e+00> : vector<64x4xf32>
    %74 = tpu.matmul %14, %73, %cst_82 {dimension_numbers = #tpu.dot_dimension_numbers<[1], [0], [0], [1], [0, 0, 1, 1], [], []>} : vector<64x8xbf16>, vector<8x4xbf16>, vector<64x4xf32> -> vector<64x4xf32>
    %c13 = arith.constant 13 : index
    %c0_83 = arith.constant 0 : index
    %c0_84 = arith.constant 0 : index
    %75 = vector.load %arg3[%c13, %c0_83, %c0_84] : memref<16x8x4xbf16, #tpu.memory_space<vmem>>, vector<1x8x4xbf16>
    %76 = vector.shape_cast %75 : vector<1x8x4xbf16> to vector<8x4xbf16>
    %cst_85 = arith.constant dense<0.000000e+00> : vector<64x4xf32>
    %77 = tpu.matmul %17, %76, %cst_85 {dimension_numbers = #tpu.dot_dimension_numbers<[1], [0], [0], [1], [0, 0, 1, 1], [], []>} : vector<64x8xbf16>, vector<8x4xbf16>, vector<64x4xf32> -> vector<64x4xf32>
    %78 = arith.addf %74, %77 : vector<64x4xf32>
    %c14 = arith.constant 14 : index
    %c0_86 = arith.constant 0 : index
    %c0_87 = arith.constant 0 : index
    %79 = vector.load %arg3[%c14, %c0_86, %c0_87] : memref<16x8x4xbf16, #tpu.memory_space<vmem>>, vector<1x8x4xbf16>
    %80 = vector.shape_cast %79 : vector<1x8x4xbf16> to vector<8x4xbf16>
    %cst_88 = arith.constant dense<0.000000e+00> : vector<64x4xf32>
    %81 = tpu.matmul %23, %80, %cst_88 {dimension_numbers = #tpu.dot_dimension_numbers<[1], [0], [0], [1], [0, 0, 1, 1], [], []>} : vector<64x8xbf16>, vector<8x4xbf16>, vector<64x4xf32> -> vector<64x4xf32>
    %82 = arith.addf %78, %81 : vector<64x4xf32>
    %c15 = arith.constant 15 : index
    %c0_89 = arith.constant 0 : index
    %c0_90 = arith.constant 0 : index
    %83 = vector.load %arg3[%c15, %c0_89, %c0_90] : memref<16x8x4xbf16, #tpu.memory_space<vmem>>, vector<1x8x4xbf16>
    %84 = vector.shape_cast %83 : vector<1x8x4xbf16> to vector<8x4xbf16>
    %cst_91 = arith.constant dense<0.000000e+00> : vector<64x4xf32>
    %85 = tpu.matmul %26, %84, %cst_91 {dimension_numbers = #tpu.dot_dimension_numbers<[1], [0], [0], [1], [0, 0, 1, 1], [], []>} : vector<64x8xbf16>, vector<8x4xbf16>, vector<64x4xf32> -> vector<64x4xf32>
    %86 = arith.addf %82, %85 : vector<64x4xf32>
    %cst_92 = arith.constant 1.000000e+00 : f32
    %87 = vector.broadcast %cst_92 : f32 to vector<1x64xf32>
    %cst_93 = arith.constant dense<0.000000e+00> : vector<1x4xf32>
    %88 = tpu.matmul %87, %41, %cst_93 {dimension_numbers = #tpu.dot_dimension_numbers<[1], [0], [0], [1], [0, 0, 1, 1], [], []>} : vector<1x64xf32>, vector<64x4xf32>, vector<1x4xf32> -> vector<1x4xf32>
    %89 = arith.mulf %41, %41 : vector<64x4xf32>
    %cst_94 = arith.constant dense<0.000000e+00> : vector<1x4xf32>
    %90 = tpu.matmul %87, %89, %cst_94 {dimension_numbers = #tpu.dot_dimension_numbers<[1], [0], [0], [1], [0, 0, 1, 1], [], []>} : vector<1x64xf32>, vector<64x4xf32>, vector<1x4xf32> -> vector<1x4xf32>
    %cst_95 = arith.constant dense<0.000000e+00> : vector<1x4xf32>
    %91 = tpu.matmul %87, %56, %cst_95 {dimension_numbers = #tpu.dot_dimension_numbers<[1], [0], [0], [1], [0, 0, 1, 1], [], []>} : vector<1x64xf32>, vector<64x4xf32>, vector<1x4xf32> -> vector<1x4xf32>
    %92 = arith.mulf %56, %56 : vector<64x4xf32>
    %cst_96 = arith.constant dense<0.000000e+00> : vector<1x4xf32>
    %93 = tpu.matmul %87, %92, %cst_96 {dimension_numbers = #tpu.dot_dimension_numbers<[1], [0], [0], [1], [0, 0, 1, 1], [], []>} : vector<1x64xf32>, vector<64x4xf32>, vector<1x4xf32> -> vector<1x4xf32>
    %94 = arith.addf %88, %91 : vector<1x4xf32>
    %95 = arith.addf %90, %93 : vector<1x4xf32>
    %cst_97 = arith.constant dense<0.000000e+00> : vector<1x4xf32>
    %96 = tpu.matmul %87, %71, %cst_97 {dimension_numbers = #tpu.dot_dimension_numbers<[1], [0], [0], [1], [0, 0, 1, 1], [], []>} : vector<1x64xf32>, vector<64x4xf32>, vector<1x4xf32> -> vector<1x4xf32>
    %97 = arith.mulf %71, %71 : vector<64x4xf32>
    %cst_98 = arith.constant dense<0.000000e+00> : vector<1x4xf32>
    %98 = tpu.matmul %87, %97, %cst_98 {dimension_numbers = #tpu.dot_dimension_numbers<[1], [0], [0], [1], [0, 0, 1, 1], [], []>} : vector<1x64xf32>, vector<64x4xf32>, vector<1x4xf32> -> vector<1x4xf32>
    %99 = arith.addf %94, %96 : vector<1x4xf32>
    %100 = arith.addf %95, %98 : vector<1x4xf32>
    %cst_99 = arith.constant dense<0.000000e+00> : vector<1x4xf32>
    %101 = tpu.matmul %87, %86, %cst_99 {dimension_numbers = #tpu.dot_dimension_numbers<[1], [0], [0], [1], [0, 0, 1, 1], [], []>} : vector<1x64xf32>, vector<64x4xf32>, vector<1x4xf32> -> vector<1x4xf32>
    %102 = arith.mulf %86, %86 : vector<64x4xf32>
    %cst_100 = arith.constant dense<0.000000e+00> : vector<1x4xf32>
    %103 = tpu.matmul %87, %102, %cst_100 {dimension_numbers = #tpu.dot_dimension_numbers<[1], [0], [0], [1], [0, 0, 1, 1], [], []>} : vector<1x64xf32>, vector<64x4xf32>, vector<1x4xf32> -> vector<1x4xf32>
    %104 = arith.addf %99, %101 : vector<1x4xf32>
    %105 = arith.addf %100, %103 : vector<1x4xf32>
    %106 = tpu.concatenate %104, %105 in 0 : vector<1x4xf32>, vector<1x4xf32> -> vector<2x4xf32>
    %107 = vector.shape_cast %106 : vector<2x4xf32> to vector<1x1x2x4xf32>
    %c0_101 = arith.constant 0 : index
    %c0_102 = arith.constant 0 : index
    %c0_103 = arith.constant 0 : index
    %c0_104 = arith.constant 0 : index
    %108 = vector.load %arg5[%c0_101, %c0_102, %c0_103, %c0_104] : memref<1x1x2x4xf32, #tpu.memory_space<vmem>>, vector<1x1x2x4xf32>
    tpu.vector_store %arg5[%c0_101, %c0_102, %c0_103, %c0_104], %107 {strides = array<i32>} : memref<1x1x2x4xf32, #tpu.memory_space<vmem>>, vector<1x1x2x4xf32>,
    %109 = tpu.concatenate %41, %56 in 1 : vector<64x4xf32>, vector<64x4xf32> -> vector<64x8xf32>
    %110 = vector.shape_cast %109 : vector<64x8xf32> to vector<8x8x8xf32>
    %111 = tpu.concatenate %71, %86 in 1 : vector<64x4xf32>, vector<64x4xf32> -> vector<64x8xf32>
    %112 = vector.shape_cast %111 : vector<64x8xf32> to vector<8x8x8xf32>
    %113 = vector.shape_cast %110 : vector<8x8x8xf32> to vector<8x1x8x8xf32>
    %114 = vector.shape_cast %112 : vector<8x8x8xf32> to vector<8x1x8x8xf32>
    %115 = tpu.concatenate %113, %114 in 1 : vector<8x1x8x8xf32>, vector<8x1x8x8xf32> -> vector<8x2x8x8xf32>
    %116 = arith.truncf %115 : vector<8x2x8x8xf32> to vector<8x2x8x8xbf16>
    %c0_105 = arith.constant 0 : index
    %c0_106 = arith.constant 0 : index
    %c0_107 = arith.constant 0 : index
    %c0_108 = arith.constant 0 : index
    %c0_109 = arith.constant 0 : index
    %117 = vector.load %arg4[%c0_105, %c0_106, %c0_107, %c0_108, %c0_109] : memref<1x8x2x8x8xbf16, #tpu.memory_space<vmem>>, vector<1x8x2x8x8xbf16>
    %118 = vector.shape_cast %117 : vector<1x8x2x8x8xbf16> to vector<8x2x8x8xbf16>
    %119 = vector.shape_cast %116 : vector<8x2x8x8xbf16> to vector<1x8x2x8x8xbf16>
    tpu.vector_store %arg4[%c0_105, %c0_106, %c0_107, %c0_108, %c0_109], %119 {strides = array<i32>} : memref<1x8x2x8x8xbf16, #tpu.memory_space<vmem>>, vector<1x8x2x8x8xbf16>,
    return
  }
  func.func @transform_0(%arg0: i32, %arg1: i32) -> (i32, i32, i32, i32, i32) {
    %c0_i32 = arith.constant 0 : i32
    %c0_i32_0 = arith.constant 0 : i32
    %c0_i32_1 = arith.constant 0 : i32
    %c0_i32_2 = arith.constant 0 : i32
    return %arg0, %arg1, %c0_i32, %c0_i32_0, %c0_i32_1 : i32, i32, i32, i32, i32
  }
  func.func @transform_1(%arg0: i32, %arg1: i32) -> (i32, i32, i32) {
    %c0_i32 = arith.constant 0 : i32
    %c0_i32_0 = arith.constant 0 : i32
    %c0_i32_1 = arith.constant 0 : i32
    %c0_i32_2 = arith.constant 0 : i32
    return %c0_i32, %c0_i32_0, %c0_i32_1 : i32, i32, i32
  }
  func.func @transform_2(%arg0: i32, %arg1: i32) -> (i32, i32, i32, i32, i32) {
    %c0_i32 = arith.constant 0 : i32
    %c0_i32_0 = arith.constant 0 : i32
    %c0_i32_1 = arith.constant 0 : i32
    %c0_i32_2 = arith.constant 0 : i32
    return %arg0, %arg1, %c0_i32, %c0_i32_0, %c0_i32_1 : i32, i32, i32, i32, i32
  }
  func.func @transform_3(%arg0: i32, %arg1: i32) -> (i32, i32, i32, i32) {
    %c0_i32 = arith.constant 0 : i32
    %c0_i32_0 = arith.constant 0 : i32
    %c0_i32_1 = arith.constant 0 : i32
    return %arg0, %arg1, %c0_i32, %c0_i32_0 : i32, i32, i32, i32
  }
}

module attributes {stable_mosaic.version = 11 : i64} {
  func.func @_bn_relu_concat_kernel(%arg0: i32, %arg1: i32, %arg2: memref<1x16x16x4xbf16, #tpu.memory_space<vmem>>, %arg3: memref<1x16x16x4xf32, #tpu.memory_space<vmem>>, %arg4: memref<1x4xf32, #tpu.memory_space<vmem>>, %arg5: memref<1x4xf32, #tpu.memory_space<vmem>>, %arg6: memref<1x16x16x8xf32, #tpu.memory_space<vmem>>) attributes {dimension_semantics = [#tpu.dimension_semantics<parallel>, #tpu.dimension_semantics<parallel>], iteration_bounds = array<i64: 2, 1>, scalar_prefetch = 0 : i64, scratch_operands = 0 : i64, tpu.core_type = #tpu.core_type<tc>, window_params = [{transform_indices = @transform_0, window_bounds = array<i64: 1, 16, 16, 4>}, {transform_indices = @transform_1, window_bounds = array<i64: 1, 16, 16, 4>}, {pipeline_mode = #tpu.pipeline_mode<synchronous>, transform_indices = @transform_2, window_bounds = array<i64: 1, 4>}, {pipeline_mode = #tpu.pipeline_mode<synchronous>, transform_indices = @transform_3, window_bounds = array<i64: 1, 4>}, {transform_indices = @transform_4, window_bounds = array<i64: 1, 16, 16, 8>}]} {
    %c0 = arith.constant 0 : index
    %c0_0 = arith.constant 0 : index
    %c0_1 = arith.constant 0 : index
    %c0_2 = arith.constant 0 : index
    %0 = vector.load %arg2[%c0, %c0_0, %c0_1, %c0_2] : memref<1x16x16x4xbf16, #tpu.memory_space<vmem>>, vector<1x16x16x4xbf16>
    %1 = vector.shape_cast %0 : vector<1x16x16x4xbf16> to vector<16x16x4xbf16>
    %2 = arith.extf %1 : vector<16x16x4xbf16> to vector<16x16x4xf32>
    %c0_3 = arith.constant 0 : index
    %c0_4 = arith.constant 0 : index
    %3 = vector.load %arg4[%c0_3, %c0_4] : memref<1x4xf32, #tpu.memory_space<vmem>>, vector<1x4xf32>
    %4 = vector.shape_cast %3 : vector<1x4xf32> to vector<1x1x4xf32>
    %5 = vector.broadcast %4 : vector<1x1x4xf32> to vector<16x16x4xf32>
    %6 = arith.mulf %2, %5 : vector<16x16x4xf32>
    %c0_5 = arith.constant 0 : index
    %c0_6 = arith.constant 0 : index
    %7 = vector.load %arg5[%c0_5, %c0_6] : memref<1x4xf32, #tpu.memory_space<vmem>>, vector<1x4xf32>
    %8 = vector.shape_cast %7 : vector<1x4xf32> to vector<1x1x4xf32>
    %9 = vector.broadcast %8 : vector<1x1x4xf32> to vector<16x16x4xf32>
    %10 = arith.addf %6, %9 : vector<16x16x4xf32>
    %cst = arith.constant 0.000000e+00 : f32
    %11 = vector.broadcast %cst : f32 to vector<16x16x4xf32>
    %12 = arith.maximumf %10, %11 : vector<16x16x4xf32>
    %c0_7 = arith.constant 0 : index
    %c0_8 = arith.constant 0 : index
    %c0_9 = arith.constant 0 : index
    %c0_10 = arith.constant 0 : index
    %13 = vector.load %arg3[%c0_7, %c0_8, %c0_9, %c0_10] : memref<1x16x16x4xf32, #tpu.memory_space<vmem>>, vector<1x16x16x4xf32>
    %14 = vector.shape_cast %13 : vector<1x16x16x4xf32> to vector<16x16x4xf32>
    %15 = tpu.concatenate %12, %14 in 2 : vector<16x16x4xf32>, vector<16x16x4xf32> -> vector<16x16x8xf32>
    %c0_11 = arith.constant 0 : index
    %c0_12 = arith.constant 0 : index
    %c0_13 = arith.constant 0 : index
    %c0_14 = arith.constant 0 : index
    %16 = vector.load %arg6[%c0_11, %c0_12, %c0_13, %c0_14] : memref<1x16x16x8xf32, #tpu.memory_space<vmem>>, vector<1x16x16x8xf32>
    %17 = vector.shape_cast %16 : vector<1x16x16x8xf32> to vector<16x16x8xf32>
    %18 = vector.shape_cast %15 : vector<16x16x8xf32> to vector<1x16x16x8xf32>
    tpu.vector_store %arg6[%c0_11, %c0_12, %c0_13, %c0_14], %18 {strides = array<i32>} : memref<1x16x16x8xf32, #tpu.memory_space<vmem>>, vector<1x16x16x8xf32>,
    return
  }
  func.func @transform_0(%arg0: i32, %arg1: i32) -> (i32, i32, i32, i32) {
    %c0_i32 = arith.constant 0 : i32
    %c0_i32_0 = arith.constant 0 : i32
    %c0_i32_1 = arith.constant 0 : i32
    return %arg0, %arg1, %c0_i32, %c0_i32_0 : i32, i32, i32, i32
  }
  func.func @transform_1(%arg0: i32, %arg1: i32) -> (i32, i32, i32, i32) {
    %c0_i32 = arith.constant 0 : i32
    %c0_i32_0 = arith.constant 0 : i32
    %c0_i32_1 = arith.constant 0 : i32
    return %arg0, %arg1, %c0_i32, %c0_i32_0 : i32, i32, i32, i32
  }
  func.func @transform_2(%arg0: i32, %arg1: i32) -> (i32, i32) {
    %c0_i32 = arith.constant 0 : i32
    %c0_i32_0 = arith.constant 0 : i32
    %c0_i32_1 = arith.constant 0 : i32
    return %c0_i32, %c0_i32_0 : i32, i32
  }
  func.func @transform_3(%arg0: i32, %arg1: i32) -> (i32, i32) {
    %c0_i32 = arith.constant 0 : i32
    %c0_i32_0 = arith.constant 0 : i32
    %c0_i32_1 = arith.constant 0 : i32
    return %c0_i32, %c0_i32_0 : i32, i32
  }
  func.func @transform_4(%arg0: i32, %arg1: i32) -> (i32, i32, i32, i32) {
    %c0_i32 = arith.constant 0 : i32
    %c0_i32_0 = arith.constant 0 : i32
    %c0_i32_1 = arith.constant 0 : i32
    return %arg0, %arg1, %c0_i32, %c0_i32_0 : i32, i32, i32, i32
  }
}

</mosaic_0001>

<bundles_post_ra>
// kernel: unet_up_forward.3
= control target key start
LH: loop header
LB: loop body
LE: loop exit
PB: predicated region body
PF: predicated region fallthrough
CT: control target
= control target key end

     0   :  { %s970_s15 = smov 0   ;;  %s972_s16 = smov 0   ;;  %s1270_s0 = inlined_call_operand.vmem [shape: bf16[2,16,16,4], index: 0, kind: input, shape index: {}]   ;;  %s1271_s1 = inlined_call_operand.vmem [shape: f32[2,16,16,4], index: 1, kind: input, shape index: {}]   ;;  %s1272_s2 = inlined_call_operand.vmem [shape: f32[1,4], index: 2, kind: input, shape index: {}]   ;;  %s1273_s3 = inlined_call_operand.vmem [shape: f32[1,4], index: 3, kind: input, shape index: {}]   ;;  %s1274_s4 = inlined_call_operand.vmem [shape: f32[2,16,16,8], index: 4, kind: output, shape index: {}]  }
   0x1   :  { %s974_s17 = smov 0  }
   0x2 LB: > { %s26_s18 = sadd.s32 1, %s938_s16  ;;  %p802_p0 = scmp.ge.s32.totalorder %s942_s17, 1  ;;  %s942_s17 = sphi %s974_s17, %s14_s17   ;;  %s938_s16 = sphi %s972_s16, %s1276_s16   ;;  %s934_s15 = sphi %s970_s15, %s1275_s15  }
   0x3   : > { %p28_p1 = scmp.ge.s32.totalorder %s26_s18, 2  ;;  %p202_p2 = scmp.lt.s32.totalorder %s942_s17, 3 }
   0x5   : > { %s1278_s18 = smov (%p28_p1, %s26_s18), 0  ;;  %p203_p3 = pnand %p802_p0, %p202_p2 }
   0x6   : > { %p249_p4 = scmp.lt.s32.totalorder (!%p203_p3), %s934_s15, 1  ;;  %s944_s23 = smov (!%p203_p3), 4  }
   0x7   : > { %206 = sbr.rel (%p203_p3) target bundleno = 193 (0xc1), region = 36 }
   0xc   : > { %s1280_s15 = smov (!%p249_p4, %s934_s15), 1  ;;  %v1073_v36 = vld [vmem:[%s1272_s2] ss:$0 sm:$0xff]  ;;  %vm615_vm0 = vcmask 31744   ;;  %vm648_vm1 = vcmask 64512  }
   0xd   : > { %s814_s19 = sshll.u32 %s1280_s15, 8  ;;  %s813_s24 = sshll.u32 %s1280_s15, 7  ;;  %v1081_v42 = vld [vmem:[%s1273_s3] ss:$0 sm:$0xff] }
   0xe   : > { %s996_s22 = scalar_lea.vmem %s1271_s1, %s814_s19  ;;  %s1066_s27 = scalar_lea.vmem %s1270_s0, %s813_s24 }
   0xf   : > { %v457_v0 = vld [vmem:[%s996_s22 + $0x10] sm:$0xff]  ;;  %v455_v1 = vld [vmem:[%s996_s22] sm:$0xff]  ;;  %v458_v2 = vld [vmem:[%s996_s22 + $0x18] sm:$0xff]  ;;  %s1098_s8 = scalar_lea.vmem %s1274_s4, %s814_s19 }
  0x10   : > { %523 = vrot.lane.b32.xlu1 %v457_v0, %s944_s23  ;;  %519 = vrot.lane.b32.xlu0 %v455_v1, %s944_s23  ;;  %v456_v3 = vld [vmem:[%s996_s22 + $0x8] sm:$0xff]  ;;  %v459_v5 = vld [vmem:[%s996_s22 + $0x20] sm:$0xff] }
  0x11   : > { %v460_v4 = vld [vmem:[%s996_s22 + $0x28] sm:$0xff]  ;;  %v462_v6 = vld [vmem:[%s996_s22 + $0x38] sm:$0xff]  ;;  %v461_v7 = vld [vmem:[%s996_s22 + $0x30] sm:$0xff] }
  0x12   : > { %v464_v8 = vld [vmem:[%s996_s22 + $0x48] sm:$0xff]  ;;  %v463_v9 = vld [vmem:[%s996_s22 + $0x40] sm:$0xff]  ;;  %v466_v10 = vld [vmem:[%s996_s22 + $0x58] sm:$0xff] }
  0x13   : > { %v465_v11 = vld [vmem:[%s996_s22 + $0x50] sm:$0xff]  ;;  %v468_v12 = vld [vmem:[%s996_s22 + $0x68] sm:$0xff]  ;;  %v467_v13 = vld [vmem:[%s996_s22 + $0x60] sm:$0xff] }
  0x14   : > { %525 = vrot.lane.b32.xlu1 %v458_v2, %s944_s23  ;;  %521 = vrot.lane.b32.xlu0 %v456_v3, %s944_s23  ;;  %v470_v14 = vld [vmem:[%s996_s22 + $0x78] sm:$0xff]  ;;  %v469_v15 = vld [vmem:[%s996_s22 + $0x70] sm:$0xff] }
  0x15   : > { %v472_v16 = vld [vmem:[%s996_s22 + $0x88] sm:$0xff]  ;;  %v471_v17 = vld [vmem:[%s996_s22 + $0x80] sm:$0xff]  ;;  %v474_v18 = vld [vmem:[%s996_s22 + $0x98] sm:$0xff] }
  0x16   : > { %v473_v19 = vld [vmem:[%s996_s22 + $0x90] sm:$0xff]  ;;  %v476_v20 = vld [vmem:[%s996_s22 + $0xa8] sm:$0xff]  ;;  %v475_v21 = vld [vmem:[%s996_s22 + $0xa0] sm:$0xff] }
  0x17   : > { %v478_v22 = vld [vmem:[%s996_s22 + $0xb8] sm:$0xff]  ;;  %v477_v23 = vld [vmem:[%s996_s22 + $0xb0] sm:$0xff]  ;;  %v480_v24 = vld [vmem:[%s996_s22 + $0xc8] sm:$0xff] }
  0x18   : > { %529 = vrot.lane.b32.xlu1 %v460_v4, %s944_s23  ;;  %527 = vrot.lane.b32.xlu0 %v459_v5, %s944_s23  ;;  %v479_v25 = vld [vmem:[%s996_s22 + $0xc0] sm:$0xff]  ;;  %v482_v26 = vld [vmem:[%s996_s22 + $0xd8] sm:$0xff] }
  0x19   : > { %v481_v27 = vld [vmem:[%s996_s22 + $0xd0] sm:$0xff]  ;;  %v484_v28 = vld [vmem:[%s996_s22 + $0xe8] sm:$0xff]  ;;  %v483_v29 = vld [vmem:[%s996_s22 + $0xe0] sm:$0xff] }
  0x1a   : > { %v486_v30 = vld [vmem:[%s996_s22 + $0xf8] sm:$0xff]  ;;  %v485_v31 = vld [vmem:[%s996_s22 + $0xf0] sm:$0xff]  ;;  %v880_v32 = vld [vmem:[%s1066_s27 + $0x8] sm:$0xff]  }
  0x1b   : > { %v817_v33 = vld [vmem:[%s1066_s27] sm:$0xff]   ;;  %v822_v34 = vunpack.c.l.bf16 %v880_v32  ;;  %v823_v37 = vunpack.c.h.bf16 %v880_v32  ;;  %v881_v38 = vld [vmem:[%s1066_s27 + $0x10] sm:$0xff]   ;;  %v882_v46 = vld [vmem:[%s1066_s27 + $0x18] sm:$0xff]  }
  0x1c   : > { %533 = vrot.lane.b32.xlu1 %v462_v6, %s944_s23  ;;  %531 = vrot.lane.b32.xlu0 %v461_v7, %s944_s23  ;;  %v818_v35 = vunpack.c.l.bf16 %v817_v33  ;;  %v819_v41 = vunpack.c.h.bf16 %v817_v33  ;;  %v827_v43 = vunpack.c.h.bf16 %v881_v38  ;;  %v826_v45 = vunpack.c.l.bf16 %v881_v38  ;;  %v883_v58 = vld [vmem:[%s1066_s27 + $0x20] sm:$0xff]   ;;  %v884_v7 = vld [vmem:[%s1066_s27 + $0x28] sm:$0xff]  }
  0x1d   : > { %v354_v39 = vmul.f32 %v822_v34, %v1073_v36  ;;  %v355_v44 = vmul.f32 %v823_v37, %v1073_v36  ;;  %v831_v51 = vunpack.c.h.bf16 %v882_v46  ;;  %v830_v54 = vunpack.c.l.bf16 %v882_v46 }
  0x1e   : > { %v352_v40 = vmul.f32 %v818_v35, %v1073_v36  ;;  %v353_v49 = vmul.f32 %v819_v41, %v1073_v36  ;;  %v357_v50 = vmul.f32 %v827_v43, %v1073_v36  ;;  %v356_v53 = vmul.f32 %v826_v45, %v1073_v36 }
  0x1f   : > { %v393_v47 = vadd.f32 %v1081_v42, %v354_v39  ;;  %v394_v52 = vadd.f32 %v1081_v42, %v355_v44  ;;  %v359_v60 = vmul.f32 %v831_v51, %v1073_v36  ;;  %v358_v1 = vmul.f32 %v830_v54, %v1073_v36  ;;  %v887_v44 = vld [vmem:[%s1066_s27 + $0x40] sm:$0xff]  }
  0x20   : > { %537 = vrot.lane.b32.xlu1 %v464_v8, %s944_s23  ;;  %535 = vrot.lane.b32.xlu0 %v463_v9, %s944_s23  ;;  %v391_v48 = vadd.f32 %v1081_v42, %v352_v40  ;;  %v392_v57 = vadd.f32 %v1081_v42, %v353_v49  ;;  %v396_v59 = vadd.f32 %v1081_v42, %v357_v50  ;;  %v835_v2 = vunpack.c.h.bf16 %v883_v58 }
  0x21   : > { %v425_v55 = vmax.f32 %v393_v47, 0.0  ;;  %v426_v63 = vmax.f32 %v394_v52, 0.0  ;;  %v395_v0 = vadd.f32 %v1081_v42, %v356_v53  ;;  %v834_v6 = vunpack.c.l.bf16 %v883_v58 }
  0x22   : > { %v423_v56 = vmax.f32 %v391_v48, 0.0  ;;  %v424_v5 = vmax.f32 %v392_v57, 0.0  ;;  %v428_v8 = vmax.f32 %v396_v59, 0.0  ;;  %v398_v9 = vadd.f32 %v1081_v42, %v359_v60 }
  0x23   : > { %v851_v50 = vunpack.c.h.bf16 %v887_v44  ;;  %v850_v60 = vunpack.c.l.bf16 %v887_v44 }
  0x24   : > { %541 = vrot.lane.b32.xlu1 %v466_v10, %s944_s23  ;;  %539 = vrot.lane.b32.xlu0 %v465_v11, %s944_s23 }
  0x28   : > { %545 = vrot.lane.b32.xlu1 %v468_v12, %s944_s23  ;;  %543 = vrot.lane.b32.xlu0 %v467_v13, %s944_s23  ;;  %v427_v12 = vmax.f32 %v395_v0, 0.0  ;;  %v397_v13 = vadd.f32 %v1081_v42, %v358_v1 }
  0x2c   : > { %549 = vrot.lane.b32.xlu1 %v470_v14, %s944_s23  ;;  %547 = vrot.lane.b32.xlu0 %v469_v15, %s944_s23  ;;  %v361_v14 = vmul.f32 %v835_v2, %v1073_v36  ;;  %v839_v15 = vunpack.c.h.bf16 %v884_v7 }
  0x30   : > { %553 = vrot.lane.b32.xlu1 %v472_v16, %s944_s23  ;;  %551 = vrot.lane.b32.xlu0 %v471_v17, %s944_s23  ;;  %v885_v16 = vld [vmem:[%s1066_s27 + $0x30] sm:$0xff]  }
  0x34   : > { %557 = vrot.lane.b32.xlu1 %v474_v18, %s944_s23  ;;  %555 = vrot.lane.b32.xlu0 %v473_v19, %s944_s23  ;;  %v360_v19 = vmul.f32 %v834_v6, %v1073_v36 }
  0x36   : > { %v399_v32 = vadd.f32 %v1081_v42, %v360_v19  ;;  %v890_v19 = vld [vmem:[%s1066_s27 + $0x58] sm:$0xff]  }
  0x38   : > { %561 = vrot.lane.b32.xlu1 %v476_v20, %s944_s23  ;;  %559 = vrot.lane.b32.xlu0 %v475_v21, %s944_s23  ;;  %v838_v20 = vunpack.c.l.bf16 %v884_v7  ;;  %v430_v21 = vmax.f32 %v398_v9, 0.0  ;;  %v431_v47 = vmax.f32 %v399_v32, 0.0  ;;  %v891_v32 = vld [vmem:[%s1066_s27 + $0x60] sm:$0xff]  }
  0x3a   : > { %v362_v33 = vmul.f32 %v838_v20, %v1073_v36 }
  0x3c   : > { %565 = vrot.lane.b32.xlu1 %v478_v22, %s944_s23  ;;  %563 = vrot.lane.b32.xlu0 %v477_v23, %s944_s23  ;;  %v843_v22 = vunpack.c.h.bf16 %v885_v16  ;;  %v401_v48 = vadd.f32 %v1081_v42, %v362_v33 }
  0x3e   : > { %v365_v34 = vmul.f32 %v843_v22, %v1073_v36  ;;  %v433_v59 = vmax.f32 %v401_v48, 0.0 }
  0x40   : > { %569 = vrot.lane.b32.xlu1 %v480_v24, %s944_s23  ;;  %567 = vrot.lane.b32.xlu0 %v479_v25, %s944_s23  ;;  %v429_v25 = vmax.f32 %v397_v13, 0.0  ;;  %v404_v54 = vadd.f32 %v1081_v42, %v365_v34 }
  0x42   : > { %v436_v2 = vmax.f32 %v404_v54, 0.0 }
  0x44   : > { %573 = vrot.lane.b32.xlu1 %v482_v26, %s944_s23  ;;  %571 = vrot.lane.b32.xlu0 %v481_v27, %s944_s23  ;;  %v400_v26 = vadd.f32 %v1081_v42, %v361_v14  ;;  %v363_v27 = vmul.f32 %v839_v15, %v1073_v36 }
  0x46   : > { %v432_v39 = vmax.f32 %v400_v26, 0.0  ;;  %v402_v40 = vadd.f32 %v1081_v42, %v363_v27 }
  0x48   : > { %577 = vrot.lane.b32.xlu1 %v484_v28, %s944_s23  ;;  %575 = vrot.lane.b32.xlu0 %v483_v29, %s944_s23  ;;  %v842_v28 = vunpack.c.l.bf16 %v885_v16  ;;  %v886_v29 = vld [vmem:[%s1066_s27 + $0x38] sm:$0xff]   ;;  %v434_v53 = vmax.f32 %v402_v40, 0.0 }
  0x49   : > { %v847_v35 = vunpack.c.h.bf16 %v886_v29  ;;  %v846_v43 = vunpack.c.l.bf16 %v886_v29 }
  0x4a   : > { %v364_v41 = vmul.f32 %v842_v28, %v1073_v36 }
  0x4b   : > { %v367_v49 = vmul.f32 %v847_v35, %v1073_v36 }
  0x4c   : > { %581 = vrot.lane.b32.xlu1 %v486_v30, %s944_s23  ;;  %579 = vrot.lane.b32.xlu0 %v485_v31, %s944_s23 }
  0x82   : > { %v524_v61 = vpop.permute.xlu1 %523  ;;  %v520_v62 = vpop.permute.xlu0 %519 }
  0x83   : > { %v618_v3 = vsel %vm615_vm0, %v425_v55, %v524_v61  ;;  %v616_v4 = vsel %vm615_vm0, %v423_v56, %v520_v62  ;;  %v403_v55 = vadd.f32 %v1081_v42, %v364_v41  ;;  %v366_v56 = vmul.f32 %v846_v43, %v1073_v36  ;;  %v888_v61 = vld [vmem:[%s1066_s27 + $0x48] sm:$0xff]  }
  0x84   : > { %651 = vst.msk [vmem:[%s1098_s8 + $0x10] sm:$0xff] %vm648_vm1, %v618_v3  ;;  %649 = vst.msk [vmem:[%s1098_s8] sm:$0xff] %vm648_vm1, %v616_v4  ;;  %v406_v62 = vadd.f32 %v1081_v42, %v367_v49  ;;  %v854_v9 = vunpack.c.l.bf16 %v888_v61 }
  0x85   : > { %v435_v3 = vmax.f32 %v403_v55, 0.0  ;;  %v405_v4 = vadd.f32 %v1081_v42, %v366_v56 }
  0x86   : > { %v526_v10 = vpop.permute.xlu1 %525  ;;  %v522_v11 = vpop.permute.xlu0 %521 }
  0x87   : > { %v619_v17 = vsel %vm615_vm0, %v426_v63, %v526_v10  ;;  %v617_v18 = vsel %vm615_vm0, %v424_v5, %v522_v11  ;;  %v369_v63 = vmul.f32 %v851_v50, %v1073_v36  ;;  %v855_v5 = vunpack.c.h.bf16 %v888_v61  ;;  %v889_v10 = vld [vmem:[%s1066_s27 + $0x50] sm:$0xff]  }
  0x88   : > { %652 = vst.msk [vmem:[%s1098_s8 + $0x18] sm:$0xff] %vm648_vm1, %v619_v17  ;;  %650 = vst.msk [vmem:[%s1098_s8 + $0x8] sm:$0xff] %vm648_vm1, %v617_v18  ;;  %v438_v11 = vmax.f32 %v406_v62, 0.0  ;;  %v437_v15 = vmax.f32 %v405_v4, 0.0  ;;  %v859_v17 = vunpack.c.h.bf16 %v889_v10  ;;  %v858_v18 = vunpack.c.l.bf16 %v889_v10 }
  0x89   : > { %v371_v16 = vmul.f32 %v855_v5, %v1073_v36  ;;  %v866_v50 = vunpack.c.l.bf16 %v891_v32 }
  0x8a   : > { %v530_v23 = vpop.permute.xlu1 %529  ;;  %v528_v24 = vpop.permute.xlu0 %527  ;;  %v373_v29 = vmul.f32 %v859_v17, %v1073_v36 }
  0x8b   : > { %v621_v30 = vsel %vm615_vm0, %v428_v8, %v530_v23  ;;  %v620_v31 = vsel %vm615_vm0, %v427_v12, %v528_v24  ;;  %v368_v8 = vmul.f32 %v850_v60, %v1073_v36  ;;  %v408_v12 = vadd.f32 %v1081_v42, %v369_v63  ;;  %v893_v60 = vld [vmem:[%s1066_s27 + $0x70] sm:$0xff]  }
  0x8c   : > { %654 = vst.msk [vmem:[%s1098_s8 + $0x28] sm:$0xff] %vm648_vm1, %v621_v30  ;;  %653 = vst.msk [vmem:[%s1098_s8 + $0x20] sm:$0xff] %vm648_vm1, %v620_v31  ;;  %v370_v23 = vmul.f32 %v854_v9, %v1073_v36  ;;  %v410_v28 = vadd.f32 %v1081_v42, %v371_v16  ;;  %v372_v30 = vmul.f32 %v858_v18, %v1073_v36  ;;  %v862_v31 = vunpack.c.l.bf16 %v890_v19 }
  0x8d   : > { %v407_v22 = vadd.f32 %v1081_v42, %v368_v8  ;;  %v440_v24 = vmax.f32 %v408_v12, 0.0  ;;  %v412_v44 = vadd.f32 %v1081_v42, %v373_v29  ;;  %v376_v63 = vmul.f32 %v866_v50, %v1073_v36 }
  0x8e   : > { %v534_v37 = vpop.permute.xlu1 %533  ;;  %v532_v38 = vpop.permute.xlu0 %531  ;;  %v442_v43 = vmax.f32 %v410_v28, 0.0  ;;  %v874_v8 = vunpack.c.l.bf16 %v893_v60 }
  0x8f   : > { %v623_v45 = vsel %vm615_vm0, %v430_v21, %v534_v37  ;;  %v622_v46 = vsel %vm615_vm0, %v429_v25, %v532_v38  ;;  %v863_v25 = vunpack.c.h.bf16 %v890_v19  ;;  %v439_v35 = vmax.f32 %v407_v22, 0.0 }
  0x90   : > { %656 = vst.msk [vmem:[%s1098_s8 + $0x38] sm:$0xff] %vm648_vm1, %v623_v45  ;;  %655 = vst.msk [vmem:[%s1098_s8 + $0x30] sm:$0xff] %vm648_vm1, %v622_v46  ;;  %v409_v37 = vadd.f32 %v1081_v42, %v370_v23  ;;  %v411_v45 = vadd.f32 %v1081_v42, %v372_v30  ;;  %v374_v46 = vmul.f32 %v862_v31, %v1073_v36  ;;  %v444_v56 = vmax.f32 %v412_v44, 0.0 }
  0x91   : > { %v375_v38 = vmul.f32 %v863_v25, %v1073_v36  ;;  %v380_v19 = vmul.f32 %v874_v8, %v1073_v36 }
  0x92   : > { %v538_v51 = vpop.permute.xlu1 %537  ;;  %v536_v52 = vpop.permute.xlu0 %535  ;;  %v441_v49 = vmax.f32 %v409_v37, 0.0 }
  0x93   : > { %v625_v57 = vsel %vm615_vm0, %v432_v39, %v538_v51  ;;  %v624_v58 = vsel %vm615_vm0, %v431_v47, %v536_v52  ;;  %v867_v39 = vunpack.c.h.bf16 %v891_v32  ;;  %v892_v51 = vld [vmem:[%s1066_s27 + $0x68] sm:$0xff]   ;;  %v414_v52 = vadd.f32 %v1081_v42, %v375_v38 }
  0x94   : > { %658 = vst.msk [vmem:[%s1098_s8 + $0x48] sm:$0xff] %vm648_vm1, %v625_v57  ;;  %657 = vst.msk [vmem:[%s1098_s8 + $0x40] sm:$0xff] %vm648_vm1, %v624_v58  ;;  %v443_v57 = vmax.f32 %v411_v45, 0.0  ;;  %v413_v58 = vadd.f32 %v1081_v42, %v374_v46  ;;  %v419_v29 = vadd.f32 %v1081_v42, %v380_v19 }
  0x95   : > { %v446_v5 = vmax.f32 %v414_v52, 0.0 }
  0x96   : > { %v542_v0 = vpop.permute.xlu1 %541  ;;  %v540_v1 = vpop.permute.xlu0 %539 }
  0x97   : > { %v627_v6 = vsel %vm615_vm0, %v434_v53, %v542_v0  ;;  %v626_v7 = vsel %vm615_vm0, %v433_v59, %v540_v1  ;;  %v377_v53 = vmul.f32 %v867_v39, %v1073_v36  ;;  %v871_v59 = vunpack.c.h.bf16 %v892_v51 }
  0x98   : > { %660 = vst.msk [vmem:[%s1098_s8 + $0x58] sm:$0xff] %vm648_vm1, %v627_v6  ;;  %659 = vst.msk [vmem:[%s1098_s8 + $0x50] sm:$0xff] %vm648_vm1, %v626_v7  ;;  %v870_v0 = vunpack.c.l.bf16 %v892_v51  ;;  %v445_v6 = vmax.f32 %v413_v58, 0.0 }
  0x99   : > { %v416_v1 = vadd.f32 %v1081_v42, %v377_v53  ;;  %v379_v7 = vmul.f32 %v871_v59, %v1073_v36 }
  0x9a   : > { %v546_v13 = vpop.permute.xlu1 %545  ;;  %v544_v14 = vpop.permute.xlu0 %543  ;;  %v378_v12 = vmul.f32 %v870_v0, %v1073_v36 }
  0x9b   : > { %v629_v20 = vsel %vm615_vm0, %v436_v2, %v546_v13  ;;  %v628_v21 = vsel %vm615_vm0, %v435_v3, %v544_v14  ;;  %v875_v2 = vunpack.c.h.bf16 %v893_v60  ;;  %v894_v13 = vld [vmem:[%s1066_s27 + $0x78] sm:$0xff]   ;;  %v448_v14 = vmax.f32 %v416_v1, 0.0 }
  0x9c   : > { %662 = vst.msk [vmem:[%s1098_s8 + $0x68] sm:$0xff] %vm648_vm1, %v629_v20  ;;  %661 = vst.msk [vmem:[%s1098_s8 + $0x60] sm:$0xff] %vm648_vm1, %v628_v21  ;;  %v418_v18 = vadd.f32 %v1081_v42, %v379_v7  ;;  %v879_v20 = vunpack.c.h.bf16 %v894_v13  ;;  %v878_v21 = vunpack.c.l.bf16 %v894_v13  ;;  %v417_v25 = vadd.f32 %v1081_v42, %v378_v12 }
  0x9e   : > { %v550_v26 = vpop.permute.xlu1 %549  ;;  %v548_v27 = vpop.permute.xlu0 %547  ;;  %v383_v30 = vmul.f32 %v879_v20, %v1073_v36  ;;  %v382_v31 = vmul.f32 %v878_v21, %v1073_v36 }
  0x9f   : > { %v631_v33 = vsel %vm615_vm0, %v438_v11, %v550_v26  ;;  %v630_v34 = vsel %vm615_vm0, %v437_v15, %v548_v27  ;;  %v415_v11 = vadd.f32 %v1081_v42, %v376_v63  ;;  %v381_v15 = vmul.f32 %v875_v2, %v1073_v36 }
  0xa0   : > { %664 = vst.msk [vmem:[%s1098_s8 + $0x78] sm:$0xff] %vm648_vm1, %v631_v33  ;;  %663 = vst.msk [vmem:[%s1098_s8 + $0x70] sm:$0xff] %vm648_vm1, %v630_v34  ;;  %v450_v34 = vmax.f32 %v418_v18, 0.0  ;;  %v421_v44 = vadd.f32 %v1081_v42, %v382_v31 }
  0xa1   : > { %v420_v28 = vadd.f32 %v1081_v42, %v381_v15 }
  0xa2   : > { %v554_v40 = vpop.permute.xlu1 %553  ;;  %v552_v41 = vpop.permute.xlu0 %551  ;;  %v453_v50 = vmax.f32 %v421_v44, 0.0 }
  0xa3   : > { %v633_v47 = vsel %vm615_vm0, %v440_v24, %v554_v40  ;;  %v632_v48 = vsel %vm615_vm0, %v439_v35, %v552_v41  ;;  %v447_v24 = vmax.f32 %v415_v11, 0.0  ;;  %v449_v35 = vmax.f32 %v417_v25, 0.0 }
  0xa4   : > { %666 = vst.msk [vmem:[%s1098_s8 + $0x88] sm:$0xff] %vm648_vm1, %v633_v47  ;;  %665 = vst.msk [vmem:[%s1098_s8 + $0x80] sm:$0xff] %vm648_vm1, %v632_v48  ;;  %v452_v39 = vmax.f32 %v420_v28, 0.0  ;;  %v451_v40 = vmax.f32 %v419_v29, 0.0 }
  0xa6   : > { %v558_v54 = vpop.permute.xlu1 %557  ;;  %v556_v55 = vpop.permute.xlu0 %555 }
  0xa7   : > { %v635_v61 = vsel %vm615_vm0, %v442_v43, %v558_v54  ;;  %v634_v62 = vsel %vm615_vm0, %v441_v49, %v556_v55  ;;  %v422_v43 = vadd.f32 %v1081_v42, %v383_v30 }
  0xa8   : > { %668 = vst.msk [vmem:[%s1098_s8 + $0x98] sm:$0xff] %vm648_vm1, %v635_v61  ;;  %667 = vst.msk [vmem:[%s1098_s8 + $0x90] sm:$0xff] %vm648_vm1, %v634_v62 }
  0xa9   : > { %v454_v49 = vmax.f32 %v422_v43, 0.0 }
  0xaa   : > { %v562_v3 = vpop.permute.xlu1 %561  ;;  %v560_v4 = vpop.permute.xlu0 %559 }
  0xab   : > { %v637_v9 = vsel %vm615_vm0, %v444_v56, %v562_v3  ;;  %v636_v10 = vsel %vm615_vm0, %v443_v57, %v560_v4 }
  0xac   : > { %670 = vst.msk [vmem:[%s1098_s8 + $0xa8] sm:$0xff] %vm648_vm1, %v637_v9  ;;  %669 = vst.msk [vmem:[%s1098_s8 + $0xa0] sm:$0xff] %vm648_vm1, %v636_v10 }
  0xae   : > { %v566_v16 = vpop.permute.xlu1 %565  ;;  %v564_v17 = vpop.permute.xlu0 %563 }
  0xaf   : > { %v639_v22 = vsel %vm615_vm0, %v446_v5, %v566_v16  ;;  %v638_v23 = vsel %vm615_vm0, %v445_v6, %v564_v17 }
  0xb0   : > { %672 = vst.msk [vmem:[%s1098_s8 + $0xb8] sm:$0xff] %vm648_vm1, %v639_v22  ;;  %671 = vst.msk [vmem:[%s1098_s8 + $0xb0] sm:$0xff] %vm648_vm1, %v638_v23 }
  0xb2   : > { %v570_v26 = vpop.permute.xlu1 %569  ;;  %v568_v27 = vpop.permute.xlu0 %567 }
  0xb3   : > { %v641_v32 = vsel %vm615_vm0, %v448_v14, %v570_v26  ;;  %v640_v33 = vsel %vm615_vm0, %v447_v24, %v568_v27 }
  0xb4   : > { %674 = vst.msk [vmem:[%s1098_s8 + $0xc8] sm:$0xff] %vm648_vm1, %v641_v32  ;;  %673 = vst.msk [vmem:[%s1098_s8 + $0xc0] sm:$0xff] %vm648_vm1, %v640_v33 }
  0xb6   : > { %v574_v37 = vpop.permute.xlu1 %573  ;;  %v572_v38 = vpop.permute.xlu0 %571 }
  0xb7   : > { %v643_v41 = vsel %vm615_vm0, %v450_v34, %v574_v37  ;;  %v642_v36 = vsel %vm615_vm0, %v449_v35, %v572_v38 }
  0xb8   : > { %676 = vst.msk [vmem:[%s1098_s8 + $0xd8] sm:$0xff] %vm648_vm1, %v643_v41  ;;  %675 = vst.msk [vmem:[%s1098_s8 + $0xd0] sm:$0xff] %vm648_vm1, %v642_v36 }
  0xba   : > { %v578_v45 = vpop.permute.xlu1 %577  ;;  %v576_v46 = vpop.permute.xlu0 %575 }
  0xbb   : > { %v645_v47 = vsel %vm615_vm0, %v452_v39, %v578_v45  ;;  %v644_v48 = vsel %vm615_vm0, %v451_v40, %v576_v46 }
  0xbc   : > { %678 = vst.msk [vmem:[%s1098_s8 + $0xe8] sm:$0xff] %vm648_vm1, %v645_v47  ;;  %677 = vst.msk [vmem:[%s1098_s8 + $0xe0] sm:$0xff] %vm648_vm1, %v644_v48 }
  0xbe   : > { %v582_v51 = vpop.permute.xlu1 %581  ;;  %v580_v52 = vpop.permute.xlu0 %579 }
  0xbf   : > { %v647_v42 = vsel %vm615_vm0, %v454_v49, %v582_v51  ;;  %v646_v53 = vsel %vm615_vm0, %v453_v50, %v580_v52 }
  0xc0   : > { %680 = vst.msk [vmem:[%s1098_s8 + $0xf8] sm:$0xff] %vm648_vm1, %v647_v42  ;;  %679 = vst.msk [vmem:[%s1098_s8 + $0xf0] sm:$0xff] %vm648_vm1, %v646_v53 }
  0xc1 PF: > { %s14_s17 = sadd.s32 1, %s942_s17   ;;  %s1275_s15 = smov %s938_s16 }
  0xc2   : > { %p11_p5 = scmp.ge.s32.totalorder %s14_s17, 4   ;;  %s1276_s16 = smov %s1278_s18 }
  0xc4   :  { %13 = sbr.rel (!%p11_p5) target bundleno = 2 (0x2), region = 69 }

// kernel: unet_up_forward.2
= control target key start
LH: loop header
LB: loop body
LE: loop exit
PB: predicated region body
PF: predicated region fallthrough
CT: control target
= control target key end

     0   :  { %s3889_s12 = smov 0   ;;  %s3891_s13 = smov 0   ;;  %s4955_s0 = inlined_call_operand.vmem [shape: bf16[2,1,10,10,8], index: 0, kind: input, shape index: {}]   ;;  %s4956_s1 = inlined_call_operand.vmem [shape: bf16[16,8,4], index: 1, kind: input, shape index: {}]   ;;  %s4957_s2 = inlined_call_operand.vmem [shape: bf16[2,8,2,8,8], index: 2, kind: output, shape index: {0}]   ;;  %s4958_s3 = inlined_call_operand.vmem [shape: f32[2,1,2,4], index: 3, kind: output, shape index: {1}]  }
   0x1   :  { %s3893_s14 = smov 0  }
   0x2 LB: > { %s26_s15 = sadd.s32 1, %s3859_s13  ;;  %p3077_p0 = scmp.ge.s32.totalorder %s3863_s14, 1  ;;  %s3863_s14 = sphi %s3893_s14, %s14_s14   ;;  %s3859_s13 = sphi %s3891_s13, %s4964_s13   ;;  %s3855_s12 = sphi %s3889_s12, %s4963_s12  }
   0x3   : > { %p28_p1 = scmp.ge.s32.totalorder %s26_s15, 2  ;;  %p162_p2 = scmp.lt.s32.totalorder %s3863_s14, 3 }
   0x5   : > { %s4966_s15 = smov (%p28_p1, %s26_s15), 0  ;;  %p163_p3 = pnand %p3077_p0, %p162_p2 }
   0x6   : > { %p202_p4 = scmp.lt.s32.totalorder (!%p163_p3), %s3855_s12, 1  ;;  %s3867_s29 = smov (!%p163_p3), 4  }
   0x7   : > { %166 = sbr.rel (%p163_p3) target bundleno = 577 (0x241), region = 28 }
   0xc   : > { %v790_v0 = vld [vmem:[%s4956_s1] sm:$0xf]  ;;  %vm818_vm0 = vcmask 1043456   ;;  %v3154_v1 = vld [vmem:[%s4956_s1 + $0x4] sm:$0xf]  ;;  %s4968_s12 = smov (!%p202_p4, %s3855_s12), 1 }
   0xd   : > { %3745 = vmatprep.subr.msk.bf16.mxu1 %vm818_vm0, %v790_v0  ;;  %v920_v2 = vsel %vm818_vm0, %v790_v0, 0  ;;  %3744 = vmatprep.subr.msk.bf16.mxu0 %vm818_vm0, %v3154_v1  ;;  %v820_v3 = vsel %vm818_vm0, %v3154_v1, 0  ;;  %v3171_v4 = vld [vmem:[%s4956_s1 + $0x8] sm:$0xf]  ;;  %v3180_v5 = vld [vmem:[%s4956_s1 + $0xc] sm:$0xf] }
   0xe   : > { %3443 = vmatpush3.bf16.msra.mxu1 %v920_v2  ;;  %3433 = vmatpush3.bf16.msra.mxu0 %v820_v3  ;;  %v3929_v6 = vld [vmem:[%s4956_s1 + $0x14] sm:$0xf]  ;;  %s3760_s26 = smul.u32 80, %s4968_s12  ;;  %v3189_v7 = vld [vmem:[%s4956_s1 + $0x10] sm:$0xf]  ;;  %vm805_vm1 = vcmask 64512  }
   0xf   : > { %3746 = vmatprep.subr.msk.bf16.mxu0 %vm818_vm0, %v3171_v4  ;;  %3747 = vmatprep.subr.msk.bf16.mxu1 %vm818_vm0, %v3180_v5  ;;  %vm246_vm2 = vsmask.f32 3328  ;;  %vm247_vm3 = vsmask.f32 7440  ;;  %v3942_v8 = vsel %vm818_vm0, %v3171_v4, 0  ;;  %v1124_v9 = vsel %vm818_vm0, %v3180_v5, 0 }
  0x10   : > { %s3939_s4 = scalar_lea.vmem %s4955_s0, %s3760_s26  ;;  %v3947_v10 = vsel %vm818_vm0, %v3929_v6, 0  ;;  %v3950_v11 = vsel %vm818_vm0, %v3189_v7, 0  ;;  %vm3972_vm4 = vmor %vm246_vm2, %vm247_vm3  ;;  %vm385_vm5 = vcmask 1042432   ;;  %vm386_vm6 = vcmask 1046532   ;;  %s3279_s30 = sshll.u32 %s4968_s12, 6 }
  0x11   : > { %v230_v12 = vld [vmem:[%s3939_s4] sm:$0xf]  ;;  %v231_v13 = vld [vmem:[%s3939_s4 + $0x8] sm:$0xf]  ;;  %v232_v14 = vld [vmem:[%s3939_s4 + $0x10] sm:$0xf]  ;;  %s4876_s6 = scalar_lea.vmem %s4957_s2, %s3279_s30 }
  0x12   : > { %v250_v15 = vshrl.u32 %v230_v12, 16  ;;  %v253_v16 = vshll.u32 %v230_v12, 16  ;;  %v264_v17 = vshrl.u32 %v231_v13, 16  ;;  %v267_v18 = vshll.u32 %v231_v13, 16  ;;  %v233_v19 = vld [vmem:[%s3939_s4 + $0x18] sm:$0xf]  ;;  %vm4139_vm7 = vmor %vm385_vm5, %vm386_vm6 }
  0x13   : > { %v3163_v20 = vcombine.low %v230_v12, %v231_v13  ;;  %v278_v21 = vshrl.u32 %v232_v14, 16  ;;  %v281_v22 = vshll.u32 %v232_v14, 16  ;;  %v292_v23 = vshrl.u32 %v233_v19, 16  ;;  %v3957_v24 = vld [vmem:[%s3939_s4 + $0x4] sm:$0x1]  ;;  %s3081_s7 = sshll.u32 %s4968_s12, 1 }
  0x14   : > { %v252_v25 = vrot.slane %v250_v15, 4  ;;  %v255_v26 = vrot.slane %v253_v16, 5  ;;  %v266_v27 = vrot.slane %v264_v17, 4  ;;  %v269_v28 = vrot.slane %v267_v18, 5  ;;  %v3960_v29 = vld [vmem:[%s3939_s4 + $0xc] sm:$0x1]  ;;  %s228_s10 = scalar_lea.vmem %s4958_s3, %s3081_s7 }
  0x15   : > { %3444 = vmatprep.mubr.msk.bf16.mxu1 %vm805_vm1, %v3163_v20  ;;  %v280_v30 = vrot.slane %v278_v21, 4  ;;  %v283_v31 = vrot.slane %v281_v22, 5  ;;  %v294_v32 = vrot.slane %v292_v23, 4  ;;  %v295_v33 = vshll.u32 %v233_v19, 16  ;;  %v3965_v38 = vld [vmem:[%s3939_s4 + $0x14] sm:$0x1] }
  0x16   : > { %v3164_v34 = vcombine.low %v232_v14, %v233_v19  ;;  %v256_v35 = vor.u32 %v255_v26, %v252_v25  ;;  %v259_v36 = vshll.u32 %v3957_v24, 16  ;;  %v270_v37 = vor.u32 %v269_v28, %v266_v27  ;;  %v3968_v39 = vld [vmem:[%s3939_s4 + $0x1c] sm:$0x1]  ;;  %v234_v49 = vld [vmem:[%s3939_s4 + $0x20] sm:$0xf] }
  0x17   : > { %v297_v40 = vrot.slane %v295_v33, 5  ;;  %v273_v42 = vshll.u32 %v3960_v29, 16  ;;  %v390_v43 = vrot.slane %v3957_v24, 5  ;;  %v394_v44 = vrot.slane %v3960_v29, 5  ;;  %v235_v54 = vld [vmem:[%s3939_s4 + $0x28] sm:$0xf] }
  0x18   : > { %3445 = vmatmul.mubr.msk.bf16.vlgmr.msra.gmra.mxu1 %vm805_vm1, %v3164_v34  ;;  %v257_v45 = vrot.slane %v256_v35, 4  ;;  %v261_v46 = vrot.slane %v259_v36, 5  ;;  %v271_v47 = vrot.slane %v270_v37, 4  ;;  %v284_v48 = vor.u32 %v283_v31, %v280_v30  ;;  %v236_v63 = vld [vmem:[%s3939_s4 + $0x30] sm:$0xf] }
  0x19   : > { %v275_v50 = vrot.slane %v273_v42, 5  ;;  %v287_v51 = vshll.u32 %v3965_v38, 16  ;;  %v298_v52 = vor.u32 %v297_v40, %v294_v32  ;;  %v301_v53 = vshll.u32 %v3968_v39, 16  ;;  %3463 = vmatpush3.bf16.msra.mxu1 %v1124_v9  ;;  %v237_v4 = vld [vmem:[%s3939_s4 + $0x38] sm:$0xf] }
  0x1a   : > { %v262_v55 = vsel %vm3972_vm4, %v257_v45, %v261_v46  ;;  %v285_v56 = vrot.slane %v284_v48, 4  ;;  %v398_v57 = vrot.slane %v3965_v38, 5  ;;  %v402_v58 = vrot.slane %v3968_v39, 5  ;;  %3749 = vmatprep.subr.msk.bf16.mxu1 %vm818_vm0, %v3189_v7  ;;  %v4000_v13 = vld [vmem:[%s3939_s4 + $0x24] sm:$0x1] }
  0x1b   : > { %v276_v59 = vsel %vm3972_vm4, %v271_v47, %v275_v50  ;;  %v289_v60 = vrot.slane %v287_v51, 5  ;;  %v299_v61 = vrot.slane %v298_v52, 4  ;;  %v303_v62 = vrot.slane %v301_v53, 5  ;;  %v4008_v22 = vld [vmem:[%s3939_s4 + $0x2c] sm:$0x1] }
  0x1c   : > { %v3992_v0 = vcombine.low %v262_v55, %v276_v59  ;;  %v306_v1 = vshrl.u32 %v234_v49, 16  ;;  %v309_v2 = vshll.u32 %v234_v49, 16  ;;  %v320_v3 = vshrl.u32 %v235_v54, 16  ;;  %v4014_v28 = vld [vmem:[%s3939_s4 + $0x34] sm:$0x1] }
  0x1d   : > { %v290_v5 = vsel %vm3972_vm4, %v285_v56, %v289_v60  ;;  %v304_v7 = vsel %vm3972_vm4, %v299_v61, %v303_v62  ;;  %v323_v9 = vshll.u32 %v235_v54, 16  ;;  %v3165_v12 = vcombine.low %v234_v49, %v235_v54  ;;  %v4017_v30 = vld [vmem:[%s3939_s4 + $0x3c] sm:$0x1]  ;;  %v3090_v35 = vld [vmem:[%s3939_s4 + $0x8] sm:$0xf] }
  0x1e   : > { %3434 = vmatprep.mubr.msk.bf16.mxu0 %vm805_vm1, %v3992_v0  ;;  %v4004_v14 = vcombine.low %v290_v5, %v304_v7  ;;  %v308_v15 = vrot.slane %v306_v1, 4  ;;  %v311_v16 = vrot.slane %v309_v2, 5  ;;  %v322_v17 = vrot.slane %v320_v3, 4  ;;  %v4028_v48 = vld [vmem:[%s3939_s4 + $0xc] sm:$0x1] }
  0x1f   : > { %v325_v18 = vrot.slane %v323_v9, 5  ;;  %3448 = vmatprep.mubr.msk.bf16.mxu1 %vm805_vm1, %v3165_v12  ;;  %v334_v19 = vshrl.u32 %v236_v63, 16  ;;  %v337_v20 = vshll.u32 %v236_v63, 16  ;;  %v348_v21 = vshrl.u32 %v237_v4, 16  ;;  %v3091_v52 = vld [vmem:[%s3939_s4 + $0x10] sm:$0xf] }
  0x20   : > { %3435 = vmatmul.mubr.msk.bf16.vlgmr.msra.gmra.mxu0 %vm805_vm1, %v4004_v14  ;;  %v351_v23 = vshll.u32 %v237_v4, 16  ;;  %v3166_v25 = vcombine.low %v236_v63, %v237_v4  ;;  %v312_v26 = vor.u32 %v311_v16, %v308_v15  ;;  %v315_v27 = vshll.u32 %v4000_v13, 16  ;;  %v4034_v56 = vld [vmem:[%s3939_s4 + $0x14] sm:$0x1]  ;;  %v3092_v1 = vld [vmem:[%s3939_s4 + $0x18] sm:$0xf] }
  0x21   : > { %3453 = vmatpush3.bf16.msra.mxu0 %v3942_v8  ;;  %v336_v31 = vrot.slane %v334_v19, 4  ;;  %v339_v32 = vrot.slane %v337_v20, 5  ;;  %v350_v33 = vrot.slane %v348_v21, 4  ;;  %v326_v34 = vor.u32 %v325_v18, %v322_v17  ;;  %v4045_v7 = vld [vmem:[%s3939_s4 + $0x1c] sm:$0x1] }
  0x22   : > { %v353_v36 = vrot.slane %v351_v23, 5  ;;  %3449 = vmatmul.mubr.msk.bf16.gmra.mxu1 %vm805_vm1, %v3166_v25  ;;  %v313_v37 = vrot.slane %v312_v26, 4  ;;  %v317_v40 = vrot.slane %v315_v27, 5  ;;  %v329_v42 = vshll.u32 %v4008_v22, 16  ;;  %3748 = vmatprep.subr.msk.bf16.mxu0 %vm818_vm0, %v3929_v6  ;;  %v3093_v17 = vld [vmem:[%s3939_s4 + $0x20] sm:$0xf] }
  0x23   : > { %v327_v45 = vrot.slane %v326_v34, 4  ;;  %v340_v8 = vor.u32 %v339_v32, %v336_v31  ;;  %v343_v46 = vshll.u32 %v4014_v28, 16  ;;  %v357_v47 = vshll.u32 %v4017_v30, 16  ;;  %v4056_v21 = vld [vmem:[%s3939_s4 + $0x24] sm:$0x1] }
  0x24   : > { %v318_v49 = vsel %vm3972_vm4, %v313_v37, %v317_v40  ;;  %v331_v50 = vrot.slane %v329_v42, 5  ;;  %v354_v51 = vor.u32 %v353_v36, %v350_v33  ;;  %v438_v53 = vshrl.u32 %v3090_v35, 16  ;;  %v4062_v37 = vld [vmem:[%s3939_s4 + $0x28] sm:$0xf] }
  0x25   : > { %v341_v54 = vrot.slane %v340_v8, 4  ;;  %v345_v55 = vrot.slane %v343_v46, 5  ;;  %v359_v6 = vrot.slane %v357_v47, 5  ;;  %v441_v59 = vshll.u32 %v3090_v35, 16  ;;  %v4066_v46 = vld [vmem:[%s3939_s4 + $0x2c] sm:$0x1] }
  0x26   : > { %v332_v60 = vsel %vm3972_vm4, %v327_v45, %v331_v50  ;;  %v355_v61 = vrot.slane %v354_v51, 4  ;;  %v440_v62 = vrot.slane %v438_v53, 4  ;;  %v447_v63 = vshll.u32 %v4028_v48, 16  ;;  %v3095_v53 = vld [vmem:[%s3939_s4 + $0x30] sm:$0xf] }
  0x27   : > { %v4040_v2 = vcombine.low %v318_v49, %v332_v60  ;;  %v346_v3 = vsel %vm3972_vm4, %v341_v54, %v345_v55  ;;  %v443_v4 = vrot.slane %v441_v59, 5  ;;  %v452_v5 = vshrl.u32 %v3091_v52, 16 }
  0x28   : > { %v360_v9 = vsel %vm3972_vm4, %v355_v61, %v359_v6  ;;  %v449_v12 = vrot.slane %v447_v63, 5  ;;  %v455_v15 = vshll.u32 %v3091_v52, 16  ;;  %v461_v16 = vshll.u32 %v4034_v56, 16  ;;  %v4078_v61 = vld [vmem:[%s3939_s4 + $0x34] sm:$0x1] }
  0x29   : > { %3438 = vmatprep.mubr.msk.bf16.mxu0 %vm805_vm1, %v4040_v2  ;;  %v4053_v18 = vcombine.low %v346_v3, %v360_v9  ;;  %v444_v19 = vor.u32 %v443_v4, %v440_v62  ;;  %v454_v20 = vrot.slane %v452_v5, 4  ;;  %v466_v23 = vshrl.u32 %v3092_v1, 16  ;;  %v3096_v5 = vld [vmem:[%s3939_s4 + $0x38] sm:$0xf] }
  0x2a   : > { %v457_v25 = vrot.slane %v455_v15, 5  ;;  %v463_v26 = vrot.slane %v461_v16, 5  ;;  %v469_v27 = vshll.u32 %v3092_v1, 16  ;;  %v475_v31 = vshll.u32 %v4045_v7, 16  ;;  %v4089_v9 = vld [vmem:[%s4956_s1 + $0x18] sm:$0xf] }
  0x2b   : > { %3439 = vmatmul.mubr.msk.bf16.gmra.mxu0 %vm805_vm1, %v4053_v18  ;;  %v445_v32 = vrot.slane %v444_v19, 4  ;;  %v468_v33 = vrot.slane %v466_v23, 4  ;;  %v480_v34 = vshrl.u32 %v3093_v17, 16  ;;  %v483_v36 = vshll.u32 %v3093_v17, 16  ;;  %v4094_v19 = vld [vmem:[%s3939_s4 + $0x3c] sm:$0x1] }
  0x2c   : > { %v458_v40 = vor.u32 %v457_v25, %v454_v20  ;;  %v471_v42 = vrot.slane %v469_v27, 5  ;;  %v477_v45 = vrot.slane %v475_v31, 5  ;;  %v489_v8 = vshll.u32 %v4056_v21, 16  ;;  %v3097_v27 = vld [vmem:[%s3939_s4 + $0x40] sm:$0xf] }
  0x2d   : > { %v450_v47 = vsel %vm3972_vm4, %v445_v32, %v449_v12  ;;  %v482_v49 = vrot.slane %v480_v34, 4  ;;  %v485_v50 = vrot.slane %v483_v36, 5  ;;  %v4070_v51 = vcombine.low %v3090_v35, %v3091_v52 }
  0x2e   : > { %v459_v54 = vrot.slane %v458_v40, 4  ;;  %v472_v55 = vor.u32 %v471_v42, %v468_v33  ;;  %v491_v6 = vrot.slane %v489_v8, 5  ;;  %v4073_v59 = vcombine.low %v3092_v1, %v3093_v17  ;;  %v4110_v42 = vld [vmem:[%s3939_s4 + $0x44] sm:$0x1] }
  0x2f   : > { %v486_v60 = vor.u32 %v485_v50, %v482_v49  ;;  %3454 = vmatprep.mubr.msk.bf16.mxu0 %vm805_vm1, %v4070_v51  ;;  %v494_v62 = vshrl.u32 %v4062_v37, 16  ;;  %v497_v35 = vshll.u32 %v4062_v37, 16  ;;  %v503_v52 = vshll.u32 %v4066_v46, 16 }
  0x30   : > { %v464_v63 = vsel %vm3972_vm4, %v459_v54, %v463_v26  ;;  %v473_v3 = vrot.slane %v472_v55, 4  ;;  %v508_v1 = vshrl.u32 %v3095_v53, 16  ;;  %v511_v4 = vshll.u32 %v3095_v53, 16 }
  0x31   : > { %v4091_v12 = vcombine.low %v450_v47, %v464_v63  ;;  %v487_v15 = vrot.slane %v486_v60, 4  ;;  %v496_v16 = vrot.slane %v494_v62, 4  ;;  %v499_v17 = vrot.slane %v497_v35, 5  ;;  %v4116_v47 = vld [vmem:[%s4956_s1 + $0x1c] sm:$0xf] }
  0x32   : > { %v478_v20 = vsel %vm3972_vm4, %v473_v3, %v477_v45  ;;  %v505_v23 = vrot.slane %v503_v52, 5  ;;  %v510_v25 = vrot.slane %v508_v1, 4  ;;  %v513_v26 = vrot.slane %v511_v4, 5  ;;  %v362_v52 = vld [vmem:[%s3939_s4 + $0x8] sm:$0xe] }
  0x33   : > { %3464 = vmatprep.mubr.msk.bf16.mxu1 %vm805_vm1, %v4091_v12  ;;  %v492_v31 = vsel %vm3972_vm4, %v487_v15, %v491_v6  ;;  %3455 = vmatmul.mubr.msk.bf16.vlgmr.msra.gmra.mxu0 %vm805_vm1, %v4073_v59  ;;  %v500_v32 = vor.u32 %v499_v17, %v496_v16  ;;  %v517_v33 = vshll.u32 %v4078_v61, 16  ;;  %v522_v34 = vshrl.u32 %v3096_v5, 16  ;;  %v361_v6 = vld [vmem:[%s3939_s4] sm:$0xe]  ;;  %v363_v15 = vld [vmem:[%s3939_s4 + $0x10] sm:$0xe] }
  0x34   : > { %v4106_v36 = vcombine.low %v478_v20, %v492_v31  ;;  %3473 = vmatpush3.bf16.msra.mxu0 %v3947_v10  ;;  %v514_v40 = vor.u32 %v513_v26, %v510_v25  ;;  %v525_v45 = vshll.u32 %v3096_v5, 16  ;;  %v531_v8 = vshll.u32 %v4094_v19, 16  ;;  %v364_v16 = vld [vmem:[%s3939_s4 + $0x18] sm:$0xe] }
  0x35   : > { %v501_v49 = vrot.slane %v500_v32, 4  ;;  %v519_v50 = vrot.slane %v517_v33, 5  ;;  %v524_v54 = vrot.slane %v522_v34, 4  ;;  %v536_v55 = vshrl.u32 %v3097_v27, 16  ;;  %3750 = vmatprep.subr.msk.bf16.mxu0 %vm818_vm0, %v4089_v9 }
  0x36   : > { %3465 = vmatmul.mubr.msk.bf16.vlgmr.msra.gmra.mxu1 %vm805_vm1, %v4106_v36  ;;  %v515_v10 = vrot.slane %v514_v40, 4  ;;  %v527_v60 = vrot.slane %v525_v45, 5  ;;  %v533_v62 = vrot.slane %v531_v8, 5  ;;  %v539_v35 = vshll.u32 %v3097_v27, 16  ;;  %v366_v40 = vld [vmem:[%s3939_s4 + $0x28] sm:$0xe] }
  0x37   : > { %3483 = vmatpush3.bf16.msra.mxu1 %v3950_v11  ;;  %v506_v63 = vsel %vm3972_vm4, %v501_v49, %v505_v23  ;;  %v538_v3 = vrot.slane %v536_v55, 4  ;;  %v545_v1 = vshll.u32 %v4110_v42, 16  ;;  %v4129_v4 = vcombine.low %v4062_v37, %v3095_v53  ;;  %v365_v37 = vld [vmem:[%s3939_s4 + $0x20] sm:$0xe] }
  0x38   : > { %v520_v17 = vsel %vm3972_vm4, %v515_v10, %v519_v50  ;;  %v528_v20 = vor.u32 %v527_v60, %v524_v54  ;;  %v541_v25 = vrot.slane %v539_v35, 5  ;;  %v4135_v26 = vcombine.low %v3096_v5, %v3097_v27  ;;  %3751 = vmatprep.subr.msk.bf16.mxu1 %vm818_vm0, %v4116_v47  ;;  %v367_v10 = vld [vmem:[%s3939_s4 + $0x30] sm:$0xe]  ;;  %v368_v60 = vld [vmem:[%s3939_s4 + $0x38] sm:$0xe] }
  0x39   : > { %v4146_v53 = vcombine.low %v506_v63, %v520_v17  ;;  %v547_v23 = vrot.slane %v545_v1, 5  ;;  %3458 = vmatprep.mubr.msk.bf16.mxu0 %vm805_vm1, %v4129_v4  ;;  %v3082_v31 = vrot.slane %v361_v6, 9  ;;  %v3083_v32 = vrot.slane %v362_v52, 9  ;;  %v3218_v1 = vld [vmem:[%s4956_s1 + $0x24] sm:$0xf] }
  0x3a   : > { %v529_v5 = vrot.slane %v528_v20, 4  ;;  %v542_v27 = vor.u32 %v541_v25, %v538_v3  ;;  %v3084_v33 = vrot.slane %v363_v15, 9  ;;  %v3085_v34 = vrot.slane %v364_v16, 9  ;;  %v3106_v15 = vld [vmem:[%s3939_s4 + $0x8] sm:$0xe] }
  0x3b   : > { %3468 = vmatprep.mubr.msk.bf16.mxu1 %vm805_vm1, %v4146_v53  ;;  %3459 = vmatmul.mubr.msk.bf16.gmra.mxu0 %vm805_vm1, %v4135_v26  ;;  %v391_v45 = vsel %vm4139_vm7, %v3082_v31, %v390_v43  ;;  %v395_v8 = vsel %vm4139_vm7, %v3083_v32, %v394_v44  ;;  %v3086_v49 = vrot.slane %v365_v37, 9  ;;  %v406_v50 = vrot.slane %v4000_v13, 5  ;;  %v3109_v31 = vld [vmem:[%s3939_s4 + $0x20] sm:$0xe] }
  0x3c   : > { %v534_v54 = vsel %vm3972_vm4, %v529_v5, %v533_v62  ;;  %v543_v55 = vrot.slane %v542_v27, 4  ;;  %v3191_v6 = vcombine.low %v391_v45, %v395_v8  ;;  %v399_v24 = vsel %vm4139_vm7, %v3084_v33, %v398_v57 }
  0x3d   : > { %v403_v29 = vsel %vm4139_vm7, %v3085_v34, %v402_v58  ;;  %v407_v43 = vsel %vm4139_vm7, %v3086_v49, %v406_v50  ;;  %v3087_v44 = vrot.slane %v366_v40, 9  ;;  %v410_v13 = vrot.slane %v4008_v22, 5  ;;  %v4236_v50 = vld [vmem:[%s3939_s4 + $0x10] sm:$0xf] }
  0x3e   : > { %v548_v38 = vsel %vm3972_vm4, %v543_v55, %v547_v23  ;;  %3474 = vmatprep.mubr.msk.bf16.mxu0 %vm805_vm1, %v3191_v6  ;;  %v3192_v62 = vcombine.low %v399_v24, %v403_v29  ;;  %v3088_v58 = vrot.slane %v367_v10, 9  ;;  %v414_v52 = vrot.slane %v4014_v28, 5  ;;  %v3217_v23 = vld [vmem:[%s4956_s1 + $0x20] sm:$0xf] }
  0x3f   : > { %v4182_v57 = vcombine.low %v534_v54, %v548_v38  ;;  %v411_v39 = vsel %vm4139_vm7, %v3087_v44, %v410_v13  ;;  %v3089_v63 = vrot.slane %v368_v60, 9  ;;  %v418_v22 = vrot.slane %v4017_v30, 5  ;;  %v3112_v54 = vld [vmem:[%s3939_s4 + $0x38] sm:$0xe]  ;;  %v3113_v6 = vld [vmem:[%s3939_s4 + $0x40] sm:$0xe] }
  0x40   : > { %v3193_v35 = vcombine.low %v407_v43, %v411_v39  ;;  %v1366_v3 = vsel %vm818_vm0, %v4089_v9, 0  ;;  %v415_v28 = vsel %vm4139_vm7, %v3088_v58, %v414_v52  ;;  %v3107_v9 = vld [vmem:[%s3939_s4 + $0x10] sm:$0xe]  ;;  %v3114_v16 = vrot.slane %v3106_v15, 9  ;;  %v3130_v13 = vld [vmem:[%s3939_s4 + $0x14] sm:$0x1] }
  0x41   : > { %3469 = vmatmul.mubr.msk.bf16.gmra.mxu1 %vm805_vm1, %v4182_v57  ;;  %v419_v30 = vsel %vm4139_vm7, %v3089_v63, %v418_v22  ;;  %v575_v20 = vrot.slane %v4028_v48, 5  ;;  %v3115_v25 = vrot.slane %v3107_v9, 9  ;;  %v579_v37 = vrot.slane %v4034_v56, 5 }
  0x42   : > { %3484 = vmatprep.mubr.msk.bf16.mxu1 %vm805_vm1, %v3992_v0  ;;  %v1468_v0 = vsel %vm818_vm0, %v4116_v47, 0  ;;  %v3194_v17 = vcombine.low %v415_v28, %v419_v30  ;;  %v3108_v47 = vld [vmem:[%s3939_s4 + $0x18] sm:$0xe]  ;;  %v583_v27 = vrot.slane %v4045_v7, 5  ;;  %v3117_v33 = vrot.slane %v3109_v31, 9 }
  0x43   : > { %3475 = vmatmul.mubr.msk.bf16.vlgmr.msra.gmra.mxu0 %vm805_vm1, %v3192_v62  ;;  %v576_v48 = vsel %vm4139_vm7, %v3114_v16, %v575_v20  ;;  %v580_v56 = vsel %vm4139_vm7, %v3115_v25, %v579_v37  ;;  %v3116_v32 = vrot.slane %v3108_v47, 9  ;;  %v587_v34 = vrot.slane %v4056_v21, 5  ;;  %v4244_v7 = vld [vmem:[%s3939_s4 + $0x18] sm:$0xf]  ;;  %v3131_v62 = vld [vmem:[%s3939_s4 + $0x1c] sm:$0x1] }
  0x44   : > { %3493 = vmatpush3.bf16.msra.mxu0 %v1366_v3  ;;  %3478 = vmatprep.mubr.msk.bf16.mxu0 %vm805_vm1, %v3193_v35  ;;  %v4229_v5 = vcombine.low %v576_v48, %v580_v56  ;;  %v591_v45 = vrot.slane %v4066_v46, 5  ;;  %v595_v49 = vrot.slane %v4078_v61, 5  ;;  %v1548_v55 = vsel %vm818_vm0, %v3218_v1, 0  ;;  %v3227_v61 = vld [vmem:[%s4956_s1 + $0x28] sm:$0xf] }
  0x45   : > { %3752 = vmatprep.subr.msk.bf16.mxu0 %vm818_vm0, %v3218_v1  ;;  %v584_v21 = vsel %vm4139_vm7, %v3116_v32, %v583_v27  ;;  %v588_v46 = vsel %vm4139_vm7, %v3117_v33, %v587_v34  ;;  %v626_v24 = vshll.u32 %v4236_v50, 16  ;;  %v3120_v43 = vrot.slane %v3112_v54, 9  ;;  %v4287_v30 = vld [vmem:[%s4956_s1 + $0x2c] sm:$0xf]  ;;  %v3138_v20 = vld [vmem:[%s3939_s4 + $0x10] sm:$0xe] }
  0x46   : > { %v599_v44 = vrot.slane %v4094_v19, 5  ;;  %v3121_v60 = vrot.slane %v3113_v6, 9  ;;  %v603_v38 = vrot.slane %v4110_v42, 5  ;;  %v637_v39 = vshrl.u32 %v4244_v7, 16  ;;  %v4275_v19 = vld [vmem:[%s3939_s4 + $0x20] sm:$0xf] }
  0x47   : > { %v640_v58 = vshll.u32 %v4244_v7, 16  ;;  %v4271_v35 = vcombine.low %v584_v21, %v588_v46  ;;  %v628_v42 = vrot.slane %v626_v24, 5  ;;  %v1616_v22 = vsel %vm818_vm0, %v3217_v23, 0  ;;  %v3139_v47 = vld [vmem:[%s3939_s4 + $0x18] sm:$0xe] }
  0x48   : > { %v600_v3 = vsel %vm4139_vm7, %v3120_v43, %v599_v44  ;;  %v632_v1 = vshll.u32 %v3130_v13, 16  ;;  %v646_v15 = vshll.u32 %v3131_v62, 16  ;;  %v604_v28 = vsel %vm4139_vm7, %v3121_v60, %v603_v38  ;;  %v3140_v48 = vld [vmem:[%s3939_s4 + $0x20] sm:$0xe]  ;;  %v3141_v27 = vld [vmem:[%s3939_s4 + $0x28] sm:$0xe] }
  0x49   : > { %3485 = vmatmul.mubr.msk.bf16.vlgmr.msra.gmra.mxu1 %vm805_vm1, %v4004_v14  ;;  %v3110_v14 = vld [vmem:[%s3939_s4 + $0x28] sm:$0xe]  ;;  %v4289_v9 = vrot.slane %v637_v39, 4  ;;  %v651_v16 = vshrl.u32 %v4275_v19, 16  ;;  %v1718_v25 = vsel %vm818_vm0, %v3227_v61, 0  ;;  %v4308_v56 = vcombine.low %v600_v3, %v604_v28 }
  0x4a   : > { %3503 = vmatpush3.bf16.msra.mxu1 %v1468_v0  ;;  %3488 = vmatprep.mubr.msk.bf16.mxu1 %vm805_vm1, %v4040_v2  ;;  %v3111_v2 = vld [vmem:[%s3939_s4 + $0x30] sm:$0xe]  ;;  %v3118_v40 = vrot.slane %v3110_v14, 9  ;;  %v4291_v0 = vrot.slane %v640_v58, 5  ;;  %v4314_v31 = vrot.slane %v632_v1, 5  ;;  %v4316_v14 = vrot.slane %v646_v15, 5 }
  0x4b   : > { %3479 = vmatmul.mubr.msk.bf16.gmra.mxu0 %vm805_vm1, %v3194_v17  ;;  %3753 = vmatprep.subr.msk.bf16.mxu1 %vm818_vm0, %v3217_v23  ;;  %v3119_v8 = vrot.slane %v3111_v2, 9  ;;  %v4297_v17 = vld [vmem:[%s3939_s4 + $0x28] sm:$0xf]  ;;  %v4304_v23 = vld [vmem:[%s3939_s4 + $0x30] sm:$0xf]  ;;  %v654_v32 = vshll.u32 %v4275_v19, 16 }
  0x4c   : > { %3494 = vmatprep.mubr.msk.bf16.mxu0 %vm805_vm1, %v4091_v12  ;;  %v592_v10 = vsel %vm4139_vm7, %v3118_v40, %v591_v45  ;;  %v4319_v2 = vld [vmem:[%s3939_s4 + $0x24] sm:$0x1]  ;;  %v643_v33 = vor.u32 %v4291_v0, %v4289_v9  ;;  %v4328_v34 = vld [vmem:[%s3939_s4 + $0x2c] sm:$0x1]  ;;  %v4330_v40 = vrot.slane %v651_v16, 4  ;;  %v665_v45 = vshrl.u32 %v4297_v17, 16 }
  0x4d   : > { %v596_v29 = vsel %vm4139_vm7, %v3119_v8, %v595_v49  ;;  %v4334_v8 = vld [vmem:[%s3939_s4 + $0x38] sm:$0xf]  ;;  %v3146_v49 = vrot.slane %v3138_v20, 9  ;;  %v668_v54 = vshll.u32 %v4297_v17, 16  ;;  %v3147_v6 = vrot.slane %v3139_v47, 9 }
  0x4e   : > { %v4277_v52 = vcombine.low %v592_v10, %v596_v29  ;;  %v764_v21 = vrot.slane %v3131_v62, 5  ;;  %v3142_v46 = vld [vmem:[%s3939_s4 + $0x30] sm:$0xe]  ;;  %v768_v24 = vrot.slane %v4319_v2, 5  ;;  %v3149_v10 = vrot.slane %v3141_v27, 9 }
  0x4f   : > { %v3143_v29 = vld [vmem:[%s3939_s4 + $0x38] sm:$0xe]  ;;  %v4343_v43 = vld [vmem:[%s3939_s4 + $0x34] sm:$0x1]  ;;  %v679_v44 = vshrl.u32 %v4304_v23, 16  ;;  %v772_v38 = vrot.slane %v4328_v34, 5 }
  0x50   : > { %v4352_v60 = vsel %vm4139_vm7, %v3147_v6, %v764_v21  ;;  %v3144_v62 = vld [vmem:[%s3939_s4 + $0x40] sm:$0xe]  ;;  %v4359_v39 = vld [vmem:[%s4956_s1 + $0x34] sm:$0xf]  ;;  %v4362_v58 = vld [vmem:[%s3939_s4 + $0x3c] sm:$0x1] }
  0x51   : > { %3489 = vmatmul.mubr.msk.bf16.gmra.mxu1 %vm805_vm1, %v4053_v18  ;;  %v623_v18 = vshrl.u32 %v4236_v50, 16  ;;  %v3150_v3 = vrot.slane %v3142_v46, 9  ;;  %v3145_v1 = vld [vmem:[%s3939_s4 + $0x48] sm:$0xe]  ;;  %v693_v15 = vshrl.u32 %v4334_v8, 16  ;;  %v4380_v9 = vsel %vm4139_vm7, %v3149_v10, %v772_v38 }
  0x52   : > { %3504 = vmatprep.mubr.msk.bf16.mxu1 %vm805_vm1, %v4229_v5  ;;  %v4376_v28 = vld [vmem:[%s3939_s4 + $0x44] sm:$0x1]  ;;  %v776_v0 = vrot.slane %v4343_v43, 5  ;;  %v3151_v16 = vrot.slane %v3143_v29, 9  ;;  %v4386_v20 = vld [vmem:[%s3939_s4 + $0x4c] sm:$0x1] }
  0x53   : > { %3495 = vmatmul.mubr.msk.bf16.vlgmr.msra.gmra.mxu0 %vm805_vm1, %v4106_v36  ;;  %v625_v63 = vrot.slane %v623_v18, 4  ;;  %v3148_v18 = vrot.slane %v3140_v48, 9  ;;  %v780_v47 = vrot.slane %v4362_v58, 5  ;;  %v3152_v48 = vrot.slane %v3144_v62, 9  ;;  %v4421_v38 = vld [vmem:[%s3939_s4 + $0x40] sm:$0xf] }
  0x54   : > { %3513 = vmatpush3.bf16.msra.mxu0 %v1548_v55  ;;  %3498 = vmatprep.mubr.msk.bf16.mxu0 %vm805_vm1, %v4146_v53  ;;  %v760_v55 = vrot.slane %v3130_v13, 5  ;;  %v784_v27 = vrot.slane %v4376_v28, 5  ;;  %v788_v6 = vrot.slane %v4386_v20, 5  ;;  %v644_v21 = vrot.slane %v643_v33, 4 }
  0x55   : > { %3754 = vmatprep.subr.msk.bf16.mxu0 %vm818_vm0, %v3227_v61  ;;  %v629_v37 = vor.u32 %v628_v42, %v625_v63  ;;  %v682_v63 = vshll.u32 %v4304_v23, 16  ;;  %v656_v46 = vrot.slane %v654_v32, 5  ;;  %v667_v10 = vrot.slane %v665_v45, 4 }
  0x56   : > { %v4348_v13 = vsel %vm4139_vm7, %v3146_v49, %v760_v55  ;;  %v696_v49 = vshll.u32 %v4334_v8, 16  ;;  %v4397_v55 = vsel %vm4139_vm7, %v3150_v3, %v776_v0  ;;  %v670_v29 = vrot.slane %v668_v54, 5  ;;  %v4426_v0 = vld [vmem:[%s3939_s4 + $0x48] sm:$0xf] }
  0x57   : > { %v4338_v61 = vrot.slane %v629_v37, 4  ;;  %v3261_v42 = vcombine.low %v4348_v13, %v4352_v60  ;;  %v1820_v32 = vsel %vm818_vm0, %v4287_v30, 0  ;;  %v681_v45 = vrot.slane %v679_v44, 4 }
  0x58   : > { %v684_v54 = vrot.slane %v682_v63, 5  ;;  %v695_v3 = vrot.slane %v693_v15, 4  ;;  %v674_v11 = vshll.u32 %v4328_v34, 16  ;;  %v657_v34 = vor.u32 %v656_v46, %v4330_v40 }
  0x59   : > { %3505 = vmatmul.mubr.msk.bf16.vlgmr.msra.gmra.mxu1 %vm805_vm1, %v4271_v35  ;;  %v635_v44 = vsel %vm3972_vm4, %v4338_v61, %v4314_v31  ;;  %v671_v63 = vor.u32 %v670_v29, %v667_v10  ;;  %v724_v15 = vshll.u32 %v4426_v0, 16  ;;  %v702_v61 = vshll.u32 %v4362_v58, 16 }
  0x5a   : > { %3523 = vmatpush3.bf16.msra.mxu1 %v1616_v22  ;;  %3508 = vmatprep.mubr.msk.bf16.mxu1 %vm805_vm1, %v4277_v52  ;;  %v4369_v22 = vsel %vm4139_vm7, %v3148_v18, %v768_v24  ;;  %v4404_v18 = vsel %vm4139_vm7, %v3151_v16, %v780_v47  ;;  %v4408_v24 = vsel %vm4139_vm7, %v3152_v48, %v784_v27  ;;  %v660_v16 = vshll.u32 %v4319_v2, 16 }
  0x5b   : > { %3499 = vmatmul.mubr.msk.bf16.gmra.mxu0 %vm805_vm1, %v4182_v57  ;;  %3755 = vmatprep.subr.msk.bf16.mxu1 %vm818_vm0, %v4287_v30  ;;  %v3262_v37 = vcombine.low %v4369_v22, %v4380_v9  ;;  %v3228_v47 = vcombine.low %v4236_v50, %v4244_v7  ;;  %v3245_v30 = vld [vmem:[%s4956_s1 + $0x30] sm:$0xf]  ;;  %v649_v2 = vsel %vm3972_vm4, %v644_v21, %v4316_v14  ;;  %v707_v50 = vshrl.u32 %v4421_v38, 16 }
  0x5c   : > { %3514 = vmatprep.mubr.msk.bf16.mxu0 %vm805_vm1, %v4091_v12  ;;  %v721_v7 = vshrl.u32 %v4426_v0, 16  ;;  %v685_v31 = vor.u32 %v684_v54, %v681_v45  ;;  %v688_v14 = vshll.u32 %v4343_v43, 16  ;;  %v676_v48 = vrot.slane %v674_v11, 5 }
  0x5d   : > { %v3237_v27 = vcombine.low %v635_v44, %v649_v2  ;;  %v709_v21 = vrot.slane %v707_v50, 4  ;;  %v726_v29 = vrot.slane %v724_v15, 5  ;;  %v704_v54 = vrot.slane %v702_v61, 5 }
  0x5e   : > { %v723_v10 = vrot.slane %v721_v7, 4  ;;  %v690_v45 = vrot.slane %v688_v14, 5  ;;  %v3230_v58 = vcombine.low %v4304_v23, %v4334_v8  ;;  %v730_v23 = vshll.u32 %v4386_v20, 16 }
  0x5f   : > { %v3231_v50 = vcombine.low %v4421_v38, %v4426_v0  ;;  %vm3866_vm8 = vmmov 0   ;;  %vm2223_vm9 = vcmask 523264   ;;  %vm2854_vm10 = vcmask 31744  }
  0x60   : > { %v727_v11 = vor.u32 %v726_v29, %v723_v10  ;;  %vm2919_vm11 = vcmask 60416   ;;  %vm2818_vm12 = vcmask 1040384   ;;  %vm2820_vm13 = vcmask 25600  }
  0x61   : > { %3509 = vmatmul.mubr.msk.bf16.gmra.mxu1 %vm805_vm1, %v4308_v56 }
  0x62   : > { %3524 = vmatprep.mubr.msk.bf16.mxu1 %vm805_vm1, %v4070_v51  ;;  %v3153_v51 = vrot.slane %v3145_v1, 9  ;;  %v698_v1 = vrot.slane %v696_v49, 5  ;;  %v658_v49 = vrot.slane %v657_v34, 4  ;;  %v728_v2 = vrot.slane %v727_v11, 4 }
  0x63   : > { %3515 = vmatmul.mubr.msk.bf16.vlgmr.msra.gmra.mxu0 %vm805_vm1, %v4106_v36  ;;  %v732_v34 = vrot.slane %v730_v23, 5 }
  0x64   : > { %3533 = vmatpush3.bf16.msra.mxu0 %v1718_v25  ;;  %3518 = vmatprep.mubr.msk.bf16.mxu0 %vm805_vm1, %v4146_v53  ;;  %v3263_v25 = vcombine.low %v4397_v55, %v4404_v18  ;;  %v4416_v33 = vsel %vm4139_vm7, %v3153_v51, %v788_v6  ;;  %v699_v40 = vor.u32 %v698_v1, %v695_v3  ;;  %v672_v51 = vrot.slane %v671_v63, 4 }
  0x65   : > { %3756 = vmatprep.subr.msk.bf16.mxu0 %vm818_vm0, %v4359_v39  ;;  %v3264_v62 = vcombine.low %v4408_v24, %v4416_v33  ;;  %v3229_v6 = vcombine.low %v4275_v19, %v4297_v17  ;;  %v1900_v19 = vsel %vm818_vm0, %v4359_v39, 0  ;;  %v716_v17 = vshll.u32 %v4376_v28, 16 }
  0x66   : > { %v700_v43 = vrot.slane %v699_v40, 4  ;;  %v677_v1 = vsel %vm3972_vm4, %v672_v51, %v676_v48  ;;  %v1968_v63 = vsel %vm818_vm0, %v3245_v30, 0  ;;  %v733_v15 = vsel %vm3972_vm4, %v728_v2, %v732_v34 }
  0x68   : > { %v705_v39 = vsel %vm3972_vm4, %v700_v43, %v704_v54 }
  0x69   : > { %3525 = vmatmul.mubr.msk.bf16.vlgmr.msra.gmra.mxu1 %vm805_vm1, %v4073_v59  ;;  %v710_v59 = vshll.u32 %v4421_v38, 16 }
  0x6a   : > { %3543 = vmatpush3.bf16.msra.mxu1 %v1820_v32  ;;  %3528 = vmatprep.mubr.msk.bf16.mxu1 %vm805_vm1, %v4129_v4  ;;  %v662_v4 = vrot.slane %v660_v16, 5  ;;  %v686_v32 = vrot.slane %v685_v31, 4 }
  0x6b   : > { %3519 = vmatmul.mubr.msk.bf16.gmra.mxu0 %vm805_vm1, %v4182_v57  ;;  %3757 = vmatprep.subr.msk.bf16.mxu1 %vm818_vm0, %v3245_v30  ;;  %v712_v46 = vrot.slane %v710_v59, 5  ;;  %v3260_v59 = vld [vmem:[%s4956_s1 + $0x3c] sm:$0xf] }
  0x6c   : > { %3534 = vmatprep.mubr.msk.bf16.mxu0 %vm805_vm1, %v3228_v47  ;;  %v663_v3 = vsel %vm3972_vm4, %v658_v49, %v662_v4  ;;  %v691_v8 = vsel %vm3972_vm4, %v686_v32, %v690_v45  ;;  %v718_v47 = vrot.slane %v716_v17, 5  ;;  %v2140_v41 = vsel %vm818_vm0, %v3260_v59, 0 }
  0x6d   : > { %v713_v16 = vor.u32 %v712_v46, %v709_v21  ;;  %v3238_v28 = vcombine.low %v663_v3, %v677_v1  ;;  %v3239_v20 = vcombine.low %v691_v8, %v705_v39 }
  0x6f   : > { %v714_v44 = vrot.slane %v713_v16, 4 }
  0x71   : > { %3529 = vmatmul.mubr.msk.bf16.gmra.mxu1 %vm805_vm1, %v4135_v26  ;;  %v3255_v26 = vld [vmem:[%s4956_s1 + $0x38] sm:$0xf]  ;;  %v719_v7 = vsel %vm3972_vm4, %v714_v44, %v718_v47 }
  0x72   : > { %3544 = vmatprep.mubr.msk.bf16.mxu1 %vm805_vm1, %v3237_v27  ;;  %v3240_v38 = vcombine.low %v719_v7, %v733_v15  ;;  %v2038_v0 = vsel %vm818_vm0, %v3255_v26, 0 }
  0x73   : > { %3535 = vmatmul.mubr.msk.bf16.vlgmr.msra.gmra.mxu0 %vm805_vm1, %v3229_v6 }
  0x74   : > { %3553 = vmatpush3.bf16.msra.mxu0 %v1900_v19  ;;  %3538 = vmatprep.mubr.msk.bf16.mxu0 %vm805_vm1, %v3230_v58 }
  0x75   : > { %3758 = vmatprep.subr.msk.bf16.mxu0 %vm818_vm0, %v3255_v26 }
  0x79   : > { %3545 = vmatmul.mubr.msk.bf16.vlgmr.msra.gmra.mxu1 %vm805_vm1, %v3238_v28 }
  0x7a   : > { %3563 = vmatpush3.bf16.msra.mxu1 %v1968_v63  ;;  %3548 = vmatprep.mubr.msk.bf16.mxu1 %vm805_vm1, %v3239_v20 }
  0x7b   : > { %3539 = vmatmul.mubr.msk.bf16.gmra.mxu0 %vm805_vm1, %v3231_v50  ;;  %3759 = vmatprep.subr.msk.bf16.mxu1 %vm818_vm0, %v3260_v59 }
  0x7c   : > { %3554 = vmatprep.mubr.msk.bf16.mxu0 %vm805_vm1, %v4229_v5 }
  0x81   : > { %3549 = vmatmul.mubr.msk.bf16.gmra.mxu1 %vm805_vm1, %v3240_v38 }
  0x82   : > { %3564 = vmatprep.mubr.msk.bf16.mxu1 %vm805_vm1, %v4091_v12  ;;  %v3865_v12 = vmov 0.0  }
  0x83   : > { %3555 = vmatmul.mubr.msk.bf16.vlgmr.msra.gmra.mxu0 %vm805_vm1, %v4271_v35 }
  0x84   : > { %3573 = vmatpush3.bf16.msra.mxu0 %v2038_v0  ;;  %3558 = vmatprep.mubr.msk.bf16.mxu0 %vm805_vm1, %v4277_v52 }
  0x85   : > { %3592 = vmatprep.subr.mxu0 %v3865_v12 }
  0x89   : > { %3565 = vmatmul.mubr.msk.bf16.vlgmr.msra.gmra.mxu1 %vm805_vm1, %v4106_v36 }
  0x8a   : > { %3583 = vmatpush3.bf16.msra.mxu1 %v2140_v41  ;;  %3568 = vmatprep.mubr.msk.bf16.mxu1 %vm805_vm1, %v4146_v53 }
  0x8b   : > { %3559 = vmatmul.mubr.msk.bf16.gmra.mxu0 %vm805_vm1, %v4308_v56  ;;  %3611 = vmatprep.subr.mxu1 %v3865_v12 }
  0x8c   : > { %3574 = vmatprep.mubr.msk.bf16.mxu0 %vm805_vm1, %v3237_v27 }
  0x91   : > { %3569 = vmatmul.mubr.msk.bf16.gmra.mxu1 %vm805_vm1, %v4182_v57 }
  0x92   : > { %3584 = vmatprep.mubr.msk.bf16.mxu1 %vm805_vm1, %v3261_v42 }
  0x93   : > { %3575 = vmatmul.mubr.msk.bf16.vlgmr.msra.gmra.mxu0 %vm805_vm1, %v3238_v28 }
  0x94   : > { %3578 = vmatprep.mubr.msk.bf16.mxu0 %vm805_vm1, %v3239_v20 }
  0x99   : > { %3585 = vmatmul.mubr.msk.bf16.vlgmr.msra.gmra.mxu1 %vm805_vm1, %v3262_v37 }
  0x9a   : > { %3588 = vmatprep.mubr.msk.bf16.mxu1 %vm805_vm1, %v3263_v25 }
  0x9b   : > { %3579 = vmatmul.mubr.msk.bf16.gmra.mxu0 %vm805_vm1, %v3240_v38 }
  0x9c   : > { %3608 = vmatprep.mubr.msk.f32.mxu0 %vm3866_vm8, %v3865_v12 }
  0xa1   : > { %3589 = vmatmul.mubr.msk.bf16.gmra.mxu1 %vm805_vm1, %v3264_v62 }
  0xa2   : > { %3627 = vmatprep.mubr.msk.f32.mxu1 %vm3866_vm8, %v3865_v12 }
  0xd8   : > { %v3446_v36 = vpop.f32.mrf.mxu1 }
  0xda   : > { %v956_v53 = vpop.f32.mrf.mxu1 }
  0xdc   : > { %v3447_v57 = vpop.f32.mrf.mxu1 }
  0xde   : > { %v959_v52 = vpop.f32.mrf.mxu1 }
  0xe0   : > { %v3436_v5 = vpop.f32.mrf.mxu0 }
  0xe1   : > { %v965_v35 = vadd.f32 %v3446_v36, %v3436_v5 }
  0xe2   : > { %v856_v56 = vpop.f32.mrf.mxu0  ;;  %v3450_v22 = vpop.f32.mrf.mxu1 }
  0xe3   : > { %v957_v13 = vadd.f32 %v956_v53, %v856_v56 }
  0xe4   : > { %v3437_v60 = vpop.f32.mrf.mxu0  ;;  %v972_v55 = vpop.f32.mrf.mxu1 }
  0xe5   : > { %v968_v42 = vadd.f32 %v3447_v57, %v3437_v60 }
  0xe6   : > { %v859_v9 = vpop.f32.mrf.mxu0  ;;  %v4543_v25 = vpop.f32.mrf.mxu1 }
  0xe7   : > { %v960_v37 = vadd.f32 %v959_v52, %v859_v9 }
  0xe8   : > { %v975_v31 = vpop.f32.mrf.mxu1 }
  0xeb   : > { %v3440_v18 = vpop.f32.mrf.mxu0 }
  0xec   : > { %v4541_v24 = vadd.f32 %v3450_v22, %v3440_v18 }
  0xed   : > { %v872_v33 = vpop.f32.mrf.mxu0 }
  0xee   : > { %v4545_v62 = vadd.f32 %v972_v55, %v872_v33 }
  0xef   : > { %v4547_v30 = vpop.f32.mrf.mxu0 }
  0xf1   : > { %v875_v14 = vpop.f32.mrf.mxu0 }
  0xf2   : > { %v4549_v40 = vadd.f32 %v975_v31, %v875_v14 }
  0xf3   : > { %v3456_v61 = vpop.f32.mrf.mxu0 }
  0xf4   : > { %v1091_v4 = vadd.f32 %v3456_v61, %v965_v35 }
  0xf5   : > { %v1058_v48 = vpop.f32.mrf.mxu0 }
  0xf6   : > { %v3466_v27 = vpop.f32.mrf.mxu1  ;;  %v1089_v49 = vadd.f32 %v1058_v48, %v957_v13 }
  0xf7   : > { %v4551_v51 = vadd.f32 %v3466_v27, %v1091_v4  ;;  %v3457_v6 = vpop.f32.mrf.mxu0 }
  0xf8   : > { %v1160_v21 = vpop.f32.mrf.mxu1  ;;  %v1092_v46 = vadd.f32 %v3457_v6, %v968_v42 }
  0xf9   : > { %v4553_v10 = vadd.f32 %v1160_v21, %v1089_v49  ;;  %v1061_v29 = vpop.f32.mrf.mxu0 }
  0xfa   : > { %v3467_v32 = vpop.f32.mrf.mxu1  ;;  %v1090_v45 = vadd.f32 %v1061_v29, %v960_v37 }
  0xfb   : > { %v4555_v43 = vadd.f32 %v3467_v32, %v1092_v46  ;;  %v4557_v54 = vpop.f32.mrf.mxu0 }
  0xfc   : > { %v1163_v58 = vpop.f32.mrf.mxu1 }
  0xfd   : > { %v4559_v3 = vadd.f32 %v1163_v58, %v1090_v45  ;;  %v4561_v19 = vpop.f32.mrf.mxu0 }
  0xff   : > { %v4563_v17 = vpop.f32.mrf.mxu0 }
 0x101   : > { %v4565_v1 = vpop.f32.mrf.mxu1  ;;  %v4567_v16 = vpop.f32.mrf.mxu0 }
 0x103   : > { %v4569_v11 = vpop.f32.mrf.mxu1  ;;  %v3476_v23 = vpop.f32.mrf.mxu0 }
 0x105   : > { %v4571_v26 = vpop.f32.mrf.mxu1  ;;  %v1264_v8 = vpop.f32.mrf.mxu0 }
 0x107   : > { %v4573_v39 = vpop.f32.mrf.mxu1  ;;  %v3477_v28 = vpop.f32.mrf.mxu0 }
 0x109   : > { %v3486_v47 = vpop.f32.mrf.mxu1  ;;  %v1267_v20 = vpop.f32.mrf.mxu0 }
 0x10a   : > { %v1341_v5 = vadd.f32 %v3486_v47, %v3476_v23 }
 0x10b   : > { %v1332_v44 = vpop.f32.mrf.mxu1  ;;  %v3480_v2 = vpop.f32.mrf.mxu0 }
 0x10c   : > { %v1333_v37 = vadd.f32 %v1332_v44, %v1264_v8 }
 0x10d   : > { %v3487_v34 = vpop.f32.mrf.mxu1  ;;  %v1280_v63 = vpop.f32.mrf.mxu0 }
 0x10e   : > { %v1344_v35 = vadd.f32 %v3487_v34, %v3477_v28 }
 0x10f   : > { %v1335_v50 = vpop.f32.mrf.mxu1  ;;  %v3481_v59 = vpop.f32.mrf.mxu0 }
 0x110   : > { %v1336_v13 = vadd.f32 %v1335_v50, %v1267_v20 }
 0x111   : > { %v3490_v7 = vpop.f32.mrf.mxu1  ;;  %v1283_v15 = vpop.f32.mrf.mxu0 }
 0x112   : > { %v1357_v27 = vadd.f32 %v3490_v7, %v3480_v2 }
 0x113   : > { %v1348_v38 = vpop.f32.mrf.mxu1  ;;  %v3496_v0 = vpop.f32.mrf.mxu0 }
 0x114   : > { %v1435_v60 = vadd.f32 %v3496_v0, %v1341_v5  ;;  %v1349_v47 = vadd.f32 %v1348_v38, %v1280_v63 }
 0x115   : > { %v3491_v41 = vpop.f32.mrf.mxu1  ;;  %v1402_v36 = vpop.f32.mrf.mxu0 }
 0x116   : > { %v1433_v14 = vadd.f32 %v1402_v36, %v1333_v37  ;;  %v1360_v49 = vadd.f32 %v3491_v41, %v3481_v59 }
 0x117   : > { %v1351_v53 = vpop.f32.mrf.mxu1  ;;  %v3497_v57 = vpop.f32.mrf.mxu0 }
 0x118   : > { %v1436_v42 = vadd.f32 %v3497_v57, %v1344_v35  ;;  %v1352_v32 = vadd.f32 %v1351_v53, %v1283_v15 }
 0x119   : > { %v3506_v52 = vpop.f32.mrf.mxu1  ;;  %v1405_v56 = vpop.f32.mrf.mxu0 }
 0x11a   : > { %v1434_v55 = vadd.f32 %v1405_v56, %v1336_v13  ;;  %v4575_v31 = vadd.f32 %v3506_v52, %v1435_v60 }
 0x11b   : > { %v1504_v22 = vpop.f32.mrf.mxu1  ;;  %v3500_v9 = vpop.f32.mrf.mxu0 }
 0x11c   : > { %v4580_v45 = vadd.f32 %v1504_v22, %v1433_v14  ;;  %v1439_v58 = vadd.f32 %v3500_v9, %v1357_v27 }
 0x11d   : > { %v3507_v18 = vpop.f32.mrf.mxu1  ;;  %v1418_v33 = vpop.f32.mrf.mxu0 }
 0x11e   : > { %v1538_v61 = vadd.f32 %v3507_v18, %v1436_v42  ;;  %v1437_v59 = vadd.f32 %v1418_v33, %v1349_v47 }
 0x11f   : > { %v1507_v4 = vpop.f32.mrf.mxu1  ;;  %v3501_v48 = vpop.f32.mrf.mxu0 }
 0x120   : > { %v4577_v6 = vadd.f32 %v1507_v4, %v1434_v55  ;;  %v3789_v21 = vpack.i.bf16 %v1538_v61, %v4575_v31  ;;  %v1440_v23 = vadd.f32 %v3501_v48, %v1360_v49  ;;  %v984_v55 = vadd.f32 %v4543_v25, %v4547_v30 }
 0x121   : > { %v3510_v46 = vpop.f32.mrf.mxu1  ;;  %v1421_v29 = vpop.f32.mrf.mxu0  ;;  %v2300_v18 = vmul.f32 %v1538_v61, %v1538_v61  ;;  %v2299_v25 = vmul.f32 %v4575_v31, %v4575_v31 }
 0x122   : > { %3790 = vrot.lane.b32.xlu0 %v3789_v21, %s3867_s29  ;;  %v1438_v20 = vadd.f32 %v1421_v29, %v1352_v32  ;;  %v3794_v44 = vpack.i.bf16 %v4577_v6, %v4580_v45  ;;  %v1541_v50 = vadd.f32 %v3510_v46, %v1439_v58  ;;  %v1096_v4 = vadd.f32 %v4563_v17, %v984_v55 }
 0x123   : > { %v1520_v8 = vpop.f32.mrf.mxu1  ;;  %v4583_v28 = vpop.f32.mrf.mxu0  ;;  %v2298_v17 = vmul.f32 %v4577_v6, %v4577_v6  ;;  %v1094_v21 = vadd.f32 %v4567_v16, %v4549_v40  ;;  %v1093_v40 = vadd.f32 %v4561_v19, %v4545_v62  ;;  %v3868_v46 = vmov 1.0  }
 0x124   : > { %v1539_v57 = vadd.f32 %v1520_v8, %v1437_v59  ;;  %v2303_v5 = vmul.f32 %v1541_v50, %v1541_v50  ;;  %v2218_v59 = vmul.f32 %v4555_v43, %v4555_v43 }
 0x125   : > { %v3511_v2 = vpop.f32.mrf.mxu1  ;;  %v4587_v34 = vpop.f32.mrf.mxu0  ;;  %v4670_v32 = vadd.f32 %v4573_v39, %v1094_v21  ;;  %v4682_v58 = vadd.f32 %v4569_v11, %v1093_v40 }
 0x126   : > { %v1542_v7 = vadd.f32 %v3511_v2, %v1440_v23  ;;  %3795 = vrot.lane.b32.xlu0 %v3794_v44, %s3867_s29  ;;  %v2301_v22 = vmul.f32 %v1539_v57, %v1539_v57 }
 0x127   : > { %v1523_v15 = vpop.f32.mrf.mxu1  ;;  %v4590_v0 = vpop.f32.mrf.mxu0  ;;  %v2220_v8 = vmul.f32 %v4670_v32, %v4670_v32 }
 0x128   : > { %v2304_v41 = vmul.f32 %v1542_v7, %v1542_v7  ;;  %v1540_v36 = vadd.f32 %v1523_v15, %v1438_v20  ;;  %3593 = vmatpush3.msra.mxu0 %v1542_v7  ;;  %v3799_v53 = vpack.i.bf16 %v1542_v7, %v1541_v50  ;;  %v2219_v20 = vmul.f32 %v4682_v58, %v4682_v58 }
 0x129   : > { %v4592_v63 = vpop.f32.mrf.mxu1  ;;  %3594 = vmatprep.subr.mxu0 %v3865_v12  ;;  %v4595_v38 = vpop.f32.mrf.mxu0 }
 0x12a   : > { %3800 = vrot.lane.b32.xlu1 %v3799_v53, %s3867_s29  ;;  %3595 = vmatpush3.msra.mxu0 %v1541_v50  ;;  %v3804_v56 = vpack.i.bf16 %v1540_v36, %v1539_v57  ;;  %v2302_v13 = vmul.f32 %v1540_v36, %v1540_v36 }
 0x12b   : > { %v4598_v35 = vpop.f32.mrf.mxu1  ;;  %3612 = vmatpush3.msra.mxu1 %v2304_v41  ;;  %3596 = vmatprep.subr.mxu0 %v3865_v12  ;;  %v4601_v52 = vpop.f32.mrf.mxu0 }
 0x12c   : > { %3613 = vmatprep.subr.mxu1 %v3865_v12  ;;  %3597 = vmatpush3.msra.mxu0 %v1540_v36  ;;  %v2217_v36 = vmul.f32 %v4551_v51, %v4551_v51 }
 0x12d   : > { %v4604_v60 = vpop.f32.mrf.mxu1  ;;  %3614 = vmatpush3.msra.mxu1 %v2303_v5  ;;  %3598 = vmatprep.subr.mxu0 %v3865_v12  ;;  %v4607_v42 = vpop.f32.mrf.mxu0 }
 0x12e   : > { %3615 = vmatprep.subr.mxu1 %v3865_v12  ;;  %3805 = vrot.lane.b32.xlu1 %v3804_v56, %s3867_s29 }
 0x12f   : > { %v4611_v9 = vpop.f32.mrf.mxu1  ;;  %3599 = vmatpush3.msra.mxu0 %v1539_v57  ;;  %3616 = vmatpush3.msra.mxu1 %v2302_v13  ;;  %v4613_v37 = vpop.f32.mrf.mxu0  ;;  %v2216_v57 = vmul.f32 %v4559_v3, %v4559_v3 }
 0x130   : > { %3600 = vmatprep.subr.mxu0 %v3865_v12  ;;  %3617 = vmatprep.subr.mxu1 %v3865_v12 }
 0x131   : > { %v4619_v33 = vpop.f32.mrf.mxu1  ;;  %3601 = vmatpush3.msra.mxu0 %v1538_v61  ;;  %3618 = vmatpush3.msra.mxu1 %v2301_v22  ;;  %v4621_v14 = vpop.f32.mrf.mxu0  ;;  %v1095_v61 = vadd.f32 %v4557_v54, %v4541_v24  ;;  %v2297_v24 = vmul.f32 %v4580_v45, %v4580_v45 }
 0x132   : > { %3602 = vmatprep.subr.mxu0 %v3865_v12  ;;  %3619 = vmatprep.subr.mxu1 %v3865_v12  ;;  %v1677_v53 = vadd.f32 %v4619_v33, %v4601_v52 }
 0x133   : > { %v4628_v30 = vpop.f32.mrf.mxu1  ;;  %3603 = vmatpush3.msra.mxu0 %v4575_v31  ;;  %3620 = vmatpush3.msra.mxu1 %v2300_v18  ;;  %v4631_v48 = vpop.f32.mrf.mxu0  ;;  %v4643_v31 = vadd.f32 %v4571_v26, %v1096_v4  ;;  %v4655_v26 = vadd.f32 %v4565_v1, %v1095_v61  ;;  %v1664_v4 = vadd.f32 %v4604_v60, %v4590_v0 }
 0x134   : > { %3604 = vmatprep.subr.mxu0 %v3865_v12  ;;  %3621 = vmatprep.subr.mxu1 %v3865_v12  ;;  %v1669_v18 = vadd.f32 %v4628_v30, %v4607_v42 }
 0x135   : > { %v3531_v27 = vpop.f32.mrf.mxu1  ;;  %3605 = vmatpush3.msra.mxu0 %v4577_v6  ;;  %3622 = vmatpush3.msra.mxu1 %v2299_v25  ;;  %v4640_v49 = vpop.f32.mrf.mxu0  ;;  %v2222_v1 = vmul.f32 %v4643_v31, %v4643_v31 }
 0x136   : > { %3606 = vmatprep.subr.mxu0 %v3865_v12  ;;  %3623 = vmatprep.subr.mxu1 %v3865_v12  ;;  %v1680_v44 = vadd.f32 %v3531_v27, %v4613_v37  ;;  %v1661_v27 = vadd.f32 %v4592_v63, %v4583_v28 }
 0x137   : > { %v1671_v54 = vpop.f32.mrf.mxu1  ;;  %3607 = vmatpush3.msra.mxu0 %v4580_v45  ;;  %3624 = vmatpush3.msra.mxu1 %v2298_v17  ;;  %v4652_v6 = vpop.f32.mrf.mxu0  ;;  %v2221_v45 = vmul.f32 %v4655_v26, %v4655_v26 }
 0x138   : > { %3625 = vmatprep.subr.mxu1 %v3865_v12  ;;  %3630 = vmatprep.subr.mxu0 %v3865_v12  ;;  %v1672_v13 = vadd.f32 %v1671_v54, %v4621_v14  ;;  %v2215_v14 = vmul.f32 %v4553_v10, %v4553_v10  ;;  %v1788_v21 = vadd.f32 %v4652_v6, %v1664_v4 }
 0x139   : > { %v4661_v16 = vpop.f32.mrf.mxu1  ;;  %3609 = vmatmul.mubr.msk.f32.vlgmr.msra.gmra.mxu0 %vm2223_vm9, %v3868_v46  ;;  %3626 = vmatpush3.msra.mxu1 %v2297_v24  ;;  %v4665_v29 = vpop.f32.mrf.mxu0  ;;  %v1656_v6 = vadd.f32 %v4611_v9, %v4595_v38 }
 0x13a   : > { %3631 = vmatpush3.msra.mxu0 %v4643_v31  ;;  %3649 = vmatprep.subr.mxu1 %v3865_v12 }
 0x13b   : > { %v4674_v62 = vpop.f32.mrf.mxu1  ;;  %3632 = vmatprep.subr.mxu0 %v3865_v12  ;;  %3628 = vmatmul.mubr.msk.f32.vlgmr.msra.gmra.mxu1 %vm2223_vm9, %v3868_v46  ;;  %v3540_v19 = vpop.f32.mrf.mxu0  ;;  %v1786_v38 = vadd.f32 %v4665_v29, %v1656_v6 }
 0x13c   : > { %3633 = vmatpush3.msra.mxu0 %v4655_v26  ;;  %3650 = vmatpush3.msra.mxu1 %v2222_v1  ;;  %v1791_v22 = vadd.f32 %v3540_v19, %v1677_v53  ;;  %v1787_v1 = vadd.f32 %v4631_v48, %v1661_v27 }
 0x13d   : > { %v4685_v39 = vpop.f32.mrf.mxu1  ;;  %3634 = vmatprep.subr.mxu0 %v3865_v12  ;;  %3651 = vmatprep.subr.mxu1 %v3865_v12  ;;  %v1770_v23 = vpop.f32.mrf.mxu0 }
 0x13e   : > { %3635 = vmatpush3.msra.mxu0 %v4670_v32  ;;  %3652 = vmatpush3.msra.mxu1 %v2221_v45  ;;  %v1789_v30 = vadd.f32 %v1770_v23, %v1669_v18  ;;  %v4780_v48 = vadd.f32 %v4685_v39, %v1788_v21  ;;  %v4793_v39 = vadd.f32 %v4661_v16, %v1787_v1 }
 0x13f   : > { %v4692_v47 = vpop.f32.mrf.mxu1  ;;  %3636 = vmatprep.subr.mxu0 %v3865_v12  ;;  %3653 = vmatprep.subr.mxu1 %v3865_v12  ;;  %v3541_v11 = vpop.f32.mrf.mxu0 }
 0x140   : > { %3637 = vmatpush3.msra.mxu0 %v4682_v58  ;;  %3654 = vmatpush3.msra.mxu1 %v2220_v8  ;;  %v1792_v7 = vadd.f32 %v3541_v11, %v1680_v44  ;;  %v1653_v8 = vadd.f32 %v4598_v35, %v4587_v34  ;;  %v2588_v44 = vmul.f32 %v4780_v48, %v4780_v48 }
 0x141   : > { %v3550_v2 = vpop.f32.mrf.mxu1  ;;  %3638 = vmatprep.subr.mxu0 %v3865_v12  ;;  %3655 = vmatprep.subr.mxu1 %v3865_v12  ;;  %v1773_v50 = vpop.f32.mrf.mxu0  ;;  %v4805_v16 = vadd.f32 %v4692_v47, %v1786_v38 }
 0x142   : > { %3639 = vmatpush3.msra.mxu0 %v4555_v43  ;;  %3656 = vmatpush3.msra.mxu1 %v2219_v20  ;;  %v1790_v33 = vadd.f32 %v1773_v50, %v1672_v13  ;;  %v4742_v42 = vadd.f32 %v3550_v2, %v1791_v22  ;;  %v1785_v34 = vadd.f32 %v4640_v49, %v1653_v8 }
 0x143   : > { %v1872_v15 = vpop.f32.mrf.mxu1  ;;  %3640 = vmatprep.subr.mxu0 %v3865_v12  ;;  %3657 = vmatprep.subr.mxu1 %v3865_v12  ;;  %v4707_v41 = vpop.f32.mrf.mxu0  ;;  %v2587_v50 = vmul.f32 %v4793_v39, %v4793_v39  ;;  %v2586_v53 = vmul.f32 %v4805_v16, %v4805_v16 }
 0x144   : > { %3641 = vmatpush3.msra.mxu0 %v4551_v51  ;;  %3658 = vmatpush3.msra.mxu1 %v2218_v59  ;;  %v2591_v28 = vmul.f32 %v4742_v42, %v4742_v42  ;;  %v4770_v63 = vadd.f32 %v1872_v15, %v1789_v30  ;;  %v4813_v59 = vadd.f32 %v4674_v62, %v1785_v34 }
 0x145   : > { %v3551_v5 = vpop.f32.mrf.mxu1  ;;  %3642 = vmatprep.subr.mxu0 %v3865_v12  ;;  %3659 = vmatprep.subr.mxu1 %v3865_v12  ;;  %v4718_v56 = vpop.f32.mrf.mxu0 }
 0x146   : > { %v4721_v37 = vadd.f32 %v3551_v5, %v1792_v7  ;;  %3643 = vmatpush3.msra.mxu0 %v4559_v3  ;;  %3660 = vmatpush3.msra.mxu1 %v2217_v36  ;;  %v2589_v20 = vmul.f32 %v4770_v63, %v4770_v63 }
 0x147   : > { %v1875_v52 = vpop.f32.mrf.mxu1  ;;  %3644 = vmatprep.subr.mxu0 %v3865_v12  ;;  %3661 = vmatprep.subr.mxu1 %v3865_v12  ;;  %v4726_v55 = vpop.f32.mrf.mxu0 }
 0x148   : > { %3645 = vmatpush3.msra.mxu0 %v4553_v10  ;;  %3662 = vmatpush3.msra.mxu1 %v2216_v57  ;;  %v2592_v17 = vmul.f32 %v4721_v37, %v4721_v37  ;;  %v4757_v24 = vadd.f32 %v1875_v52, %v1790_v33  ;;  %v2585_v52 = vmul.f32 %v4813_v59, %v4813_v59 }
 0x149   : > { %v4735_v25 = vpop.f32.mrf.mxu1  ;;  %3646 = vmatprep.mubr.msk.f32.mxu0 %vm3866_vm8, %v3865_v12  ;;  %3663 = vmatprep.subr.mxu1 %v3865_v12  ;;  %v4740_v61 = vpop.f32.mrf.mxu0 }
 0x14a   : > { %3668 = vmatprep.subr.mxu0 %v3865_v12  ;;  %3647 = vmatmul.mubr.msk.f32.vlgmr.msra.gmra.mxu0 %vm2223_vm9, %v3868_v46  ;;  %v2590_v23 = vmul.f32 %v4757_v24, %v4757_v24  ;;  %v2013_v15 = vadd.f32 %v4735_v25, %v4707_v41 }
 0x14b   : > { %v4749_v0 = vpop.f32.mrf.mxu1  ;;  %3664 = vmatpush3.msra.mxu1 %v2215_v14  ;;  %3669 = vmatpush3.msra.mxu0 %v4721_v37  ;;  %v4752_v60 = vpop.f32.mrf.mxu0 }
 0x14c   : > { %3665 = vmatprep.mubr.msk.f32.mxu1 %vm3866_vm8, %v3865_v12  ;;  %3670 = vmatprep.subr.mxu0 %v3865_v12  ;;  %v2005_v62 = vadd.f32 %v4749_v0, %v4718_v56 }
 0x14d   : > { %v3567_v54 = vpop.f32.mrf.mxu1  ;;  %3687 = vmatprep.subr.mxu1 %v3865_v12  ;;  %3666 = vmatmul.mubr.msk.f32.vlgmr.msra.gmra.mxu1 %vm2223_vm9, %v3868_v46  ;;  %v4765_v40 = vpop.f32.mrf.mxu0 }
 0x14e   : > { %3671 = vmatpush3.msra.mxu0 %v4742_v42  ;;  %3688 = vmatpush3.msra.mxu1 %v2592_v17  ;;  %v2016_v36 = vadd.f32 %v3567_v54, %v4726_v55 }
 0x14f   : > { %v2007_v19 = vpop.f32.mrf.mxu1  ;;  %3672 = vmatprep.subr.mxu0 %v3865_v12  ;;  %3689 = vmatprep.subr.mxu1 %v3865_v12  ;;  %v4777_v45 = vpop.f32.mrf.mxu0 }
 0x150   : > { %3673 = vmatpush3.msra.mxu0 %v4757_v24  ;;  %3690 = vmatpush3.msra.mxu1 %v2591_v28  ;;  %v2008_v13 = vadd.f32 %v2007_v19, %v4740_v61 }
 0x151   : > { %v3570_v9 = vpop.f32.mrf.mxu1  ;;  %3674 = vmatprep.subr.mxu0 %v3865_v12  ;;  %3691 = vmatprep.subr.mxu1 %v3865_v12  ;;  %v4790_v11 = vpop.f32.mrf.mxu0 }
 0x152   : > { %3675 = vmatpush3.msra.mxu0 %v4770_v63  ;;  %3692 = vmatpush3.msra.mxu1 %v2590_v23  ;;  %v2029_v30 = vadd.f32 %v3570_v9, %v4752_v60 }
 0x153   : > { %v2020_v35 = vpop.f32.mrf.mxu1  ;;  %3676 = vmatprep.subr.mxu0 %v3865_v12  ;;  %3693 = vmatprep.subr.mxu1 %v3865_v12  ;;  %v3576_v29 = vpop.f32.mrf.mxu0 }
 0x154   : > { %3677 = vmatpush3.msra.mxu0 %v4780_v48  ;;  %3694 = vmatpush3.msra.mxu1 %v2589_v20  ;;  %v2107_v41 = vadd.f32 %v3576_v29, %v2013_v15  ;;  %v2021_v28 = vadd.f32 %v2020_v35, %v4765_v40 }
 0x155   : > { %v3571_v2 = vpop.f32.mrf.mxu1  ;;  %3678 = vmatprep.subr.mxu0 %v3865_v12  ;;  %3695 = vmatprep.subr.mxu1 %v3865_v12  ;;  %v2074_v49 = vpop.f32.mrf.mxu0 }
 0x156   : > { %3679 = vmatpush3.msra.mxu0 %v4793_v39  ;;  %3696 = vmatpush3.msra.mxu1 %v2588_v44  ;;  %v2105_v18 = vadd.f32 %v2074_v49, %v2005_v62  ;;  %v2032_v27 = vadd.f32 %v3571_v2, %v4777_v45 }
 0x157   : > { %v2023_v7 = vpop.f32.mrf.mxu1  ;;  %3680 = vmatprep.subr.mxu0 %v3865_v12  ;;  %3697 = vmatprep.subr.mxu1 %v3865_v12  ;;  %v3577_v47 = vpop.f32.mrf.mxu0 }
 0x158   : > { %3681 = vmatpush3.msra.mxu0 %v4805_v16  ;;  %3698 = vmatpush3.msra.mxu1 %v2587_v50  ;;  %v2108_v22 = vadd.f32 %v3577_v47, %v2016_v36  ;;  %v2024_v23 = vadd.f32 %v2023_v7, %v4790_v11 }
 0x159   : > { %v3586_v57 = vpop.f32.mrf.mxu1  ;;  %3682 = vmatprep.subr.mxu0 %v3865_v12  ;;  %3699 = vmatprep.subr.mxu1 %v3865_v12  ;;  %v2077_v5 = vpop.f32.mrf.mxu0 }
 0x15a   : > { %3683 = vmatpush3.msra.mxu0 %v4813_v59  ;;  %3684 = vmatprep.mubr.msk.f32.mxu0 %vm3866_vm8, %v3865_v12  ;;  %v2106_v33 = vadd.f32 %v2077_v5, %v2008_v13  ;;  %v2209_v25 = vadd.f32 %v3586_v57, %v2107_v41 }
 0x15b   : > { %v2176_v55 = vpop.f32.mrf.mxu1  ;;  %3700 = vmatpush3.msra.mxu1 %v2586_v53  ;;  %3685 = vmatmul.mubr.msk.f32.vlgmr.msra.gmra.mxu0 %vm2223_vm9, %v3868_v46  ;;  %v3580_v56 = vpop.f32.mrf.mxu0 }
 0x15c   : > { %3701 = vmatprep.subr.mxu1 %v3865_v12  ;;  %3703 = vmatprep.mubr.msk.f32.mxu1 %vm3866_vm8, %v3865_v12  ;;  %v2207_v21 = vadd.f32 %v2176_v55, %v2105_v18  ;;  %v2111_v60 = vadd.f32 %v3580_v56, %v2029_v30  ;;  %v2737_v53 = vmul.f32 %v2209_v25, %v2209_v25 }
 0x15d   : > { %v3587_v14 = vpop.f32.mrf.mxu1  ;;  %3702 = vmatpush3.msra.mxu1 %v2585_v52  ;;  %v2090_v4 = vpop.f32.mrf.mxu0  ;;  %3706 = vmatprep.subr.mxu0 %v3865_v12 }
 0x15e   : > { %3704 = vmatmul.mubr.msk.f32.vlgmr.msra.gmra.mxu1 %vm2223_vm9, %v3868_v46  ;;  %v2210_v61 = vadd.f32 %v3587_v14, %v2108_v22  ;;  %3725 = vmatprep.subr.mxu1 %v3865_v12  ;;  %v2109_v20 = vadd.f32 %v2090_v4, %v2021_v28  ;;  %v2735_v57 = vmul.f32 %v2207_v21, %v2207_v21 }
 0x15f   : > { %v2179_v17 = vpop.f32.mrf.mxu1  ;;  %v3581_v0 = vpop.f32.mrf.mxu0  ;;  %3722 = vmatprep.mubr.msk.f32.mxu0 %vm3866_vm8, %v3865_v12  ;;  %3741 = vmatprep.mubr.msk.f32.mxu1 %vm3866_vm8, %v3865_v12 }
 0x160   : > { %v2208_v54 = vadd.f32 %v2179_v17, %v2106_v33  ;;  %v3809_v1 = vpack.i.bf16 %v2210_v61, %v2209_v25  ;;  %v2112_v8 = vadd.f32 %v3581_v0, %v2032_v27  ;;  %v2738_v36 = vmul.f32 %v2210_v61, %v2210_v61 }
 0x161   : > { %v3590_v6 = vpop.f32.mrf.mxu1  ;;  %v2093_v19 = vpop.f32.mrf.mxu0 }
 0x162   : > { %3810 = vrot.lane.b32.xlu1 %v3809_v1, %s3867_s29  ;;  %v3814_v38 = vpack.i.bf16 %v2208_v54, %v2207_v21  ;;  %v2110_v34 = vadd.f32 %v2093_v19, %v2024_v23  ;;  %v2213_v29 = vadd.f32 %v3590_v6, %v2111_v60  ;;  %v2736_v62 = vmul.f32 %v2208_v54, %v2208_v54 }
 0x163   : > { %v2192_v9 = vpop.f32.mrf.mxu1 }
 0x164   : > { %3815 = vrot.lane.b32.xlu0 %v3814_v38, %s3867_s29  ;;  %v2211_v49 = vadd.f32 %v2192_v9, %v2109_v20  ;;  %v2741_v7 = vmul.f32 %v2213_v29, %v2213_v29 }
 0x165   : > { %v3591_v45 = vpop.f32.mrf.mxu1 }
 0x166   : > { %v2214_v44 = vadd.f32 %v3591_v45, %v2112_v8  ;;  %v2739_v15 = vmul.f32 %v2211_v49, %v2211_v49 }
 0x167   : > { %v2195_v2 = vpop.f32.mrf.mxu1 }
 0x168   : > { %v2742_v40 = vmul.f32 %v2214_v44, %v2214_v44  ;;  %v2212_v35 = vadd.f32 %v2195_v2, %v2110_v34  ;;  %3707 = vmatpush3.msra.mxu0 %v2214_v44  ;;  %v3824_v50 = vpack.i.bf16 %v2214_v44, %v2213_v29 }
 0x169   : > { %3708 = vmatprep.subr.mxu0 %v3865_v12 }
 0x16a   : > { %3825 = vrot.lane.b32.xlu1 %v3824_v50, %s3867_s29  ;;  %3709 = vmatpush3.msra.mxu0 %v2213_v29  ;;  %v3819_v11 = vpack.i.bf16 %v2212_v35, %v2211_v49  ;;  %v2740_v47 = vmul.f32 %v2212_v35, %v2212_v35 }
 0x16b   : > { %3726 = vmatpush3.msra.mxu1 %v2742_v40  ;;  %3710 = vmatprep.subr.mxu0 %v3865_v12 }
 0x16c   : > { %3727 = vmatprep.subr.mxu1 %v3865_v12  ;;  %3820 = vrot.lane.b32.xlu0 %v3819_v11, %s3867_s29 }
 0x16d   : > { %3711 = vmatpush3.msra.mxu0 %v2212_v35  ;;  %3728 = vmatpush3.msra.mxu1 %v2741_v7 }
 0x16e   : > { %3712 = vmatprep.subr.mxu0 %v3865_v12  ;;  %3729 = vmatprep.subr.mxu1 %v3865_v12 }
 0x16f   : > { %3713 = vmatpush3.msra.mxu0 %v2211_v49  ;;  %3730 = vmatpush3.msra.mxu1 %v2740_v47 }
 0x170   : > { %3714 = vmatprep.subr.mxu0 %v3865_v12  ;;  %3731 = vmatprep.subr.mxu1 %v3865_v12 }
 0x171   : > { %3715 = vmatpush3.msra.mxu0 %v2210_v61  ;;  %3732 = vmatpush3.msra.mxu1 %v2739_v15 }
 0x172   : > { %3716 = vmatprep.subr.mxu0 %v3865_v12  ;;  %3733 = vmatprep.subr.mxu1 %v3865_v12 }
 0x173   : > { %3717 = vmatpush3.msra.mxu0 %v2209_v25  ;;  %3734 = vmatpush3.msra.mxu1 %v2738_v36 }
 0x174   : > { %3718 = vmatprep.subr.mxu0 %v3865_v12  ;;  %3735 = vmatprep.subr.mxu1 %v3865_v12 }
 0x175   : > { %3719 = vmatpush3.msra.mxu0 %v2208_v54  ;;  %3736 = vmatpush3.msra.mxu1 %v2737_v53 }
 0x176   : > { %3720 = vmatprep.subr.mxu0 %v3865_v12  ;;  %3737 = vmatprep.subr.mxu1 %v3865_v12 }
 0x177   : > { %3721 = vmatpush3.msra.mxu0 %v2207_v21  ;;  %3738 = vmatpush3.msra.mxu1 %v2736_v62 }
 0x178   : > { %3723 = vmatmul.mubr.msk.f32.vlgmr.msra.gmra.mxu0 %vm2223_vm9, %v3868_v46  ;;  %3739 = vmatprep.subr.mxu1 %v3865_v12 }
 0x179   : > { %3740 = vmatpush3.msra.mxu1 %v2735_v57 }
 0x17a   : > { %3742 = vmatmul.mubr.msk.f32.vlgmr.msra.gmra.mxu1 %vm2223_vm9, %v3868_v46 }
 0x194   : > { %v3791_v5 = vpop.permute.xlu0 %3790 }
 0x195   : > { %v3793_v13 = vunpack.i.h.bf16 %v3791_v5  ;;  %v3792_v41 = vunpack.i.l.bf16 %v3791_v5 }
 0x197   : > { %v2858_v12 = vsel %vm2854_vm10, %v4555_v43, %v3793_v13  ;;  %v2857_v46 = vsel %vm2854_vm10, %v4551_v51, %v3792_v41 }
 0x198   : > { %v2909_v22 = vpack.c.bf16 %v2858_v12, %v2858_v12  ;;  %v2907_v52 = vpack.c.bf16 %v2857_v46, %v2857_v46  ;;  %v3796_v55 = vpop.permute.xlu0 %3795 }
 0x199   : > { %v3798_v56 = vunpack.i.h.bf16 %v3796_v55  ;;  %v3797_v18 = vunpack.i.l.bf16 %v3796_v55 }
 0x19a   : > { %2926 = vst.msk [vmem:[%s4876_s6 + $0x18] sm:$0xf] %vm2919_vm11, %v2909_v22  ;;  %2924 = vst.msk [vmem:[%s4876_s6 + $0x10] sm:$0xf] %vm2919_vm11, %v2907_v52 }
 0x19b   : > { %v2856_v33 = vsel %vm2854_vm10, %v4559_v3, %v3798_v56  ;;  %v2855_v43 = vsel %vm2854_vm10, %v4553_v10, %v3797_v18 }
 0x19c   : > { %v2905_v14 = vpack.c.bf16 %v2856_v33, %v2856_v33  ;;  %v2903_v51 = vpack.c.bf16 %v2855_v43, %v2855_v43  ;;  %v3801_v4 = vpop.permute.xlu1 %3800 }
 0x19d   : > { %v3803_v25 = vunpack.i.h.bf16 %v3801_v4  ;;  %v3802_v61 = vunpack.i.l.bf16 %v3801_v4 }
 0x19e   : > { %2922 = vst.msk [vmem:[%s4876_s6 + $0x8] sm:$0xf] %vm2919_vm11, %v2905_v14  ;;  %2920 = vst.msk [vmem:[%s4876_s6] sm:$0xf] %vm2919_vm11, %v2903_v51 }
 0x19f   : > { %v2862_v30 = vsel %vm2854_vm10, %v4643_v31, %v3803_v25  ;;  %v2861_v3 = vsel %vm2854_vm10, %v4655_v26, %v3802_v61 }
 0x1a0   : > { %v2917_v17 = vpack.c.bf16 %v2862_v30, %v2862_v30  ;;  %v2915_v10 = vpack.c.bf16 %v2861_v3, %v2861_v3  ;;  %v3806_v0 = vpop.permute.xlu1 %3805 }
 0x1a1   : > { %v3808_v27 = vunpack.i.h.bf16 %v3806_v0  ;;  %v3807_v21 = vunpack.i.l.bf16 %v3806_v0 }
 0x1a2   : > { %2934 = vst.msk [vmem:[%s4876_s6 + $0x38] sm:$0xf] %vm2919_vm11, %v2917_v17  ;;  %2932 = vst.msk [vmem:[%s4876_s6 + $0x30] sm:$0xf] %vm2919_vm11, %v2915_v10 }
 0x1a3   : > { %v2859_v54 = vsel %vm2854_vm10, %v4682_v58, %v3807_v21  ;;  %v2860_v1 = vsel %vm2854_vm10, %v4670_v32, %v3808_v27 }
 0x1a4   : > { %v2911_v28 = vpack.c.bf16 %v2859_v54, %v2859_v54  ;;  %v2913_v31 = vpack.c.bf16 %v2860_v1, %v2860_v1 }
 0x1a6   : > { %2928 = vst.msk [vmem:[%s4876_s6 + $0x20] sm:$0xf] %vm2919_vm11, %v2911_v28  ;;  %2930 = vst.msk [vmem:[%s4876_s6 + $0x28] sm:$0xf] %vm2919_vm11, %v2913_v31 }
 0x1d4   : > { %v3811_v26 = vpop.permute.xlu1 %3810 }
 0x1d5   : > { %v3813_v6 = vunpack.i.h.bf16 %v3811_v26  ;;  %v3812_v19 = vunpack.i.l.bf16 %v3811_v26 }
 0x1d6   : > { %v3816_v23 = vpop.permute.xlu0 %3815 }
 0x1d7   : > { %v2898_v58 = vsel %vm2854_vm10, %v4780_v48, %v3813_v6  ;;  %v2897_v32 = vsel %vm2854_vm10, %v4793_v39, %v3812_v19  ;;  %v3818_v60 = vunpack.i.h.bf16 %v3816_v23  ;;  %v3817_v8 = vunpack.i.l.bf16 %v3816_v23 }
 0x1d8   : > { %v2910_v38 = vpack.c.bf16 %v2898_v58, %v2898_v58  ;;  %v2908_v9 = vpack.c.bf16 %v2897_v32, %v2897_v32 }
 0x1d9   : > { %v2896_v20 = vsel %vm2854_vm10, %v4805_v16, %v3818_v60  ;;  %v2895_v34 = vsel %vm2854_vm10, %v4813_v59, %v3817_v8 }
 0x1da   : > { %2927 = vst.msk [vmem:[%s4876_s6 + $0x1c] sm:$0xf] %vm2919_vm11, %v2910_v38  ;;  %2925 = vst.msk [vmem:[%s4876_s6 + $0x14] sm:$0xf] %vm2919_vm11, %v2908_v9  ;;  %v2906_v45 = vpack.c.bf16 %v2896_v20, %v2896_v20  ;;  %v2904_v48 = vpack.c.bf16 %v2895_v34, %v2895_v34 }
 0x1dc   : > { %2923 = vst.msk [vmem:[%s4876_s6 + $0xc] sm:$0xf] %vm2919_vm11, %v2906_v45  ;;  %2921 = vst.msk [vmem:[%s4876_s6 + $0x4] sm:$0xf] %vm2919_vm11, %v2904_v48  ;;  %v3826_v39 = vpop.permute.xlu1 %3825 }
 0x1dd   : > { %v3828_v29 = vunpack.i.h.bf16 %v3826_v39  ;;  %v3827_v16 = vunpack.i.l.bf16 %v3826_v39 }
 0x1de   : > { %v3821_v44 = vpop.permute.xlu0 %3820 }
 0x1df   : > { %v2902_v59 = vsel %vm2854_vm10, %v4721_v37, %v3828_v29  ;;  %v2901_v2 = vsel %vm2854_vm10, %v4742_v42, %v3827_v16  ;;  %v3823_v49 = vunpack.i.h.bf16 %v3821_v44  ;;  %v3822_v40 = vunpack.i.l.bf16 %v3821_v44 }
 0x1e0   : > { %v2918_v35 = vpack.c.bf16 %v2902_v59, %v2902_v59  ;;  %v2916_v50 = vpack.c.bf16 %v2901_v2, %v2901_v2 }
 0x1e1   : > { %v2899_v11 = vsel %vm2854_vm10, %v4770_v63, %v3822_v40  ;;  %v2900_v7 = vsel %vm2854_vm10, %v4757_v24, %v3823_v49 }
 0x1e2   : > { %2935 = vst.msk [vmem:[%s4876_s6 + $0x3c] sm:$0xf] %vm2919_vm11, %v2918_v35  ;;  %2933 = vst.msk [vmem:[%s4876_s6 + $0x34] sm:$0xf] %vm2919_vm11, %v2916_v50  ;;  %v2912_v47 = vpack.c.bf16 %v2899_v11, %v2899_v11  ;;  %v2914_v15 = vpack.c.bf16 %v2900_v7, %v2900_v7 }
 0x1e4   : > { %2929 = vst.msk [vmem:[%s4876_s6 + $0x24] sm:$0xf] %vm2919_vm11, %v2912_v47  ;;  %2931 = vst.msk [vmem:[%s4876_s6 + $0x2c] sm:$0xf] %vm2919_vm11, %v2914_v15 }
 0x1f9   : > { %v2293_v37 = vpop.f32.mrf.mxu0 }
 0x1fb   : > { %v2371_v42 = vpop.f32.mrf.mxu1  ;;  %v3610_v36 = vpop.f32.mrf.mxu0 }
 0x1fd   : > { %v3629_v53 = vpop.f32.mrf.mxu1 }
 0x20a   : > { %v2441_v62 = vpop.f32.mrf.mxu0 }
 0x20b   : > { %v2442_v52 = vadd.f32 %v2441_v62, %v2293_v37 }
 0x20c   : > { %v3648_v63 = vpop.f32.mrf.mxu0 }
 0x20d   : > { %v2511_v57 = vpop.f32.mrf.mxu1 }
 0x20e   : > { %v2512_v46 = vadd.f32 %v2511_v57, %v2371_v42 }
 0x20f   : > { %v3667_v5 = vpop.f32.mrf.mxu1 }
 0x21b   : > { %v2581_v24 = vpop.f32.mrf.mxu0 }
 0x21c   : > { %v2663_v33 = vadd.f32 %v2581_v24, %v2442_v52 }
 0x21d   : > { %v3686_v13 = vpop.f32.mrf.mxu0 }
 0x21e   : > { %v2659_v41 = vpop.f32.mrf.mxu1 }
 0x21f   : > { %v2664_v55 = vadd.f32 %v2659_v41, %v2512_v46 }
 0x220   : > { %v3705_v12 = vpop.f32.mrf.mxu1 }
 0x238   : > { %v2731_v22 = vpop.f32.mrf.mxu0 }
 0x239   : > { %v2813_v51 = vadd.f32 %v2731_v22, %v2663_v33 }
 0x23a   : > { %v2809_v56 = vpop.f32.mrf.mxu1  ;;  %v3724_v18 = vpop.f32.mrf.mxu0 }
 0x23b   : > { %v2814_v43 = vadd.f32 %v2809_v56, %v2664_v55 }
 0x23c   : > { %v3743_v14 = vpop.f32.mrf.mxu1 }
 0x23d   : > { %v2816_v4 = vrot.slane %v2814_v43, 7 }
 0x23f   : > { %v2819_v25 = vsel %vm2818_vm12, %v2813_v51, %v2816_v4 }
 0x240   : > { %2821 = vst.msk [vmem:[%s228_s10] sm:$0x3] %vm2820_vm13, %v2819_v25 }
 0x241 PF: > { %s14_s14 = sadd.s32 1, %s3863_s14   ;;  %s4963_s12 = smov %s3859_s13 }
 0x242   : > { %p11_p5 = scmp.ge.s32.totalorder %s14_s14, 4   ;;  %s4964_s13 = smov %s4966_s15 }
 0x244   :  { %13 = sbr.rel (!%p11_p5) target bundleno = 2 (0x2), region = 87 }

</bundles_post_ra>
